<compile_context>
chip_gen: v7x
topology: tpu7x:2x2x1
jax: 0.10.0
libtpu: 0.0.40
codegen_flags: <defaults>
</compile_context>

<pallas_src>
import functools

import jax
import jax.numpy as jnp
from jax.experimental import pallas as pl
from jax.experimental.pallas import tpu as pltpu

STRIP_ROWS = 8           # sublanes per strip (one f32 vreg row-group)
LANES = 256              # lanes per strip  -> per-plane strip = (8, 256) f32 = 2 vregs
TOKENS_PER_STRIP = STRIP_ROWS * LANES
NEG_FILL = -1e18         # sentinel used by the reference for missing coords (unused here)


def _chip_config():
    """Return (max_strips_per_block, vmem_limit_bytes, tensorcores_per_chip)."""
    try:
        kind = jax.devices()[0].device_kind.lower()
    except Exception:
        kind = ""
    if "v7" in kind:
        # 64 MiB VMEM -> cap the double-buffered working set to ~20 MiB; 2 TCs.
        return 64, 48 << 20, 2
    if any(t in kind for t in ("v6", "v5e", "v5 lite", "v5litepod")):
        # 128 MiB VMEM, 1 TC.
        return 128, 96 << 20, 1
    if any(t in kind for t in ("v4", "v5p")):
        # 128 MiB VMEM, megacore (2 TCs).
        return 128, 96 << 20, 2
    # Unknown chip / interpret mode: conservative.
    return 64, 48 << 20, 1


def _rna_loss_kernel(coords_ref, logits_ref, tok_ref, out_ref, acc_ref, *,
                     n_tokens, num_inner, strips_per_block, num_pos, num_coord,
                     clean_coords):
    """One grid step processes a [strips_per_block*8, 256] token slab per plane.

    tok_ref planes: [0]=mask, [1]=resid_pred, [2]=resid_target, [3]=resname_target(f32)
    acc_ref planes: [0]=mask, [1]=ce*mask, [2]=(resid_pred-resid_tgt)^2*mask,
                    [3]=coverage exp terms (valid tokens only).
    """
    nc = logits_ref.shape[0]
    o = pl.program_id(0)
    i = pl.program_id(1)
    blk = o * num_inner + i

    @pl.when(i == 0)
    def _init():
        acc_ref[...] = jnp.zeros_like(acc_ref)

    block_token0 = blk * (strips_per_block * TOKENS_PER_STRIP)
    row_iota = jax.lax.broadcasted_iota(jnp.int32, (STRIP_ROWS, LANES), 0)
    lane_iota = jax.lax.broadcasted_iota(jnp.int32, (STRIP_ROWS, LANES), 1)
    strip_tok_base = row_iota * LANES + lane_iota          # token offset within a strip
    num_pairs = num_pos * (num_pos - 1) // 2

    def strip_body(s, carry):
        acc_mask, acc_ce, acc_rsq, acc_cov = carry
        r0 = pl.multiple_of(s * STRIP_ROWS, STRIP_ROWS)

        mask = tok_ref[0, pl.ds(r0, STRIP_ROWS), :]
        resid_pred = tok_ref[1, pl.ds(r0, STRIP_ROWS), :]
        resid_tgt = tok_ref[2, pl.ds(r0, STRIP_ROWS), :]
        resname_tgt = tok_ref[3, pl.ds(r0, STRIP_ROWS), :]

        # ---- resname cross-entropy (nc classes, raw logits like the reference) ----
        logits = [logits_ref[k, pl.ds(r0, STRIP_ROWS), :] for k in range(nc)]
        mx = logits[0]
        for k in range(1, nc):
            mx = jnp.maximum(mx, logits[k])
        sum_exp = jnp.exp(logits[0] - mx)
        for k in range(1, nc):
            sum_exp = sum_exp + jnp.exp(logits[k] - mx)
        lse = mx + jnp.log(sum_exp)
        tgt = jnp.clip(resname_tgt, 0.0, float(nc - 1))     # reference clamps too
        tgt_logit = logits[nc - 1]
        for k in range(nc - 2, -1, -1):
            tgt_logit = jnp.where(tgt == float(k), logits[k], tgt_logit)
        ce = lse - tgt_logit

        # ---- resid MSE ----
        rsq = (resid_pred - resid_tgt) ** 2

        acc_mask = acc_mask + mask
        acc_ce = acc_ce + ce * mask
        acc_rsq = acc_rsq + rsq * mask

        # ---- coverage over all position pairs of (cleaned) coords_pred ----
        if num_pairs > 0:
            tok = block_token0 + s * TOKENS_PER_STRIP + strip_tok_base
            valid = (tok < n_tokens).astype(jnp.float32)    # exclude padded tokens
            cp = []
            for k in range(num_pos * num_coord):
                v = coords_ref[k, pl.ds(r0, STRIP_ROWS), :]
                if clean_coords:
                    # clean_tensor: nan / +-inf -> 0 (abs(x) < inf is False for those)
                    v = jnp.where(jnp.abs(v) < jnp.inf, v, 0.0)
                cp.append(v)
            cov = jnp.zeros((STRIP_ROWS, LANES), jnp.float32)
            for pi in range(num_pos):
                for pj in range(pi + 1, num_pos):
                    d = jnp.zeros((STRIP_ROWS, LANES), jnp.float32)
                    for c in range(num_coord):
                        diff = cp[num_coord * pi + c] - cp[num_coord * pj + c]
                        d = d + diff * diff
                    cov = cov + jnp.exp(-jnp.clip(d, 1e-6, 50.0))
            acc_cov = acc_cov + cov * valid

        return (acc_mask, acc_ce, acc_rsq, acc_cov)

    zeros = jnp.zeros((STRIP_ROWS, LANES), jnp.float32)
    acc_mask, acc_ce, acc_rsq, acc_cov = jax.lax.fori_loop(
        0, strips_per_block, strip_body, (zeros, zeros, zeros, zeros),
        unroll=min(4, strips_per_block))

    # One small VMEM accumulation per grid step (not per strip).
    acc_ref[0] += acc_mask
    acc_ref[1] += acc_ce
    acc_ref[2] += acc_rsq
    acc_ref[3] += acc_cov

    # ---- finalize this outer chunk: 4 cross-lane reductions, one lane-dense write ----
    @pl.when(i == num_inner - 1)
    def _finalize():
        s_mask = jnp.sum(acc_ref[0])
        s_ce = jnp.sum(acc_ref[1])
        s_rsq = jnp.sum(acc_ref[2])
        s_cov = jnp.sum(acc_ref[3])
        r = jax.lax.broadcasted_iota(jnp.int32, (8, 128), 0)
        l = jax.lax.broadcasted_iota(jnp.int32, (8, 128), 1)
        vals = jnp.where((r == 0) & (l == 0), s_mask, 0.0)
        vals = vals + jnp.where((r == 0) & (l == 1), s_ce, 0.0)
        vals = vals + jnp.where((r == 0) & (l == 2), s_rsq, 0.0)
        vals = vals + jnp.where((r == 0) & (l == 3), s_cov, 0.0)
        out_ref[0] = vals


def rna_structure_loss(predictions, targets, mask=None, output_mask=None,
                       coord_weight=1.0, resname_weight=0.5, resid_weight=0.5,
                       coverage_weight=0.1, assume_finite_coords=False):
    coords_pred = jnp.asarray(predictions['coords_pred'], jnp.float32)
    resname_logits = jnp.asarray(predictions['resname_logits'], jnp.float32)
    resid_pred = jnp.asarray(predictions['resid_pred'], jnp.float32)
    resname_target = jnp.asarray(targets['resnames'], jnp.int32)
    resid_target = jnp.asarray(targets['resids'], jnp.float32)
    # targets['coords'] and output_mask only feed coord_loss, which the reference's
    # exception path forces to 0 for any multi-element coords -> they are never read.

    if coords_pred.ndim != 4:
        # TODO(synk): only the 4D [B, S, P, C] coords_pred case is wired up; the
        # reference's dim-mismatch / unsqueeze / single-element-coord branches are not
        # reproduced here.
        raise NotImplementedError("only 4D coords_pred is supported in this kernel")
    if coords_pred.size <= 1:
        # Single-element coords would take the non-exception coord_loss path in the
        # reference; not supported here.
        raise NotImplementedError("single-element coords_pred is not supported")

    B, S, P, C = coords_pred.shape
    NC = resname_logits.shape[-1]
    if NC > 8:
        raise NotImplementedError("resname vocabulary > 8 not supported (fully unrolled)")
    N = B * S
    if mask is None:
        mask = jnp.ones((B, S), jnp.float32)
    else:
        mask = jnp.asarray(mask, jnp.float32)

    # ---- token-axis tiling / padding ---------------------------------------------------
    max_strips_per_block, vmem_limit, num_tc = _chip_config()
    total_strips = -(-N // TOKENS_PER_STRIP)
    strips_per_block = min(max_strips_per_block, total_strips)
    num_blocks = -(-total_strips // strips_per_block)
    num_split = num_tc if (num_tc > 1 and num_blocks >= num_tc) else 1
    num_blocks = -(-num_blocks // num_split) * num_split
    num_inner = num_blocks // num_split
    block_rows = strips_per_block * STRIP_ROWS
    r_total = num_blocks * block_rows
    n_pad = r_total * LANES

    def to_planes(x2d):                # (N, K) -> (K, r_total, LANES), lane-dense tokens
        if n_pad > N:
            x2d = jnp.pad(x2d, ((0, n_pad - N), (0, 0)))
        return x2d.T.reshape(x2d.shape[1], r_total, LANES)

    coords_k = to_planes(coords_pred.reshape(N, P * C))       # [P*C, r_total, LANES]
    logits_k = to_planes(resname_logits.reshape(N, NC))       # [NC,  r_total, LANES]

    # Pack the four scalar-per-token planes into one array -> fewer DMAs per grid step.
    tok_stack = jnp.stack([
        mask.reshape(N),
        resid_pred.reshape(N),
        resid_target.reshape(N),
        resname_target.reshape(N).astype(jnp.float32),
    ], axis=0)                                                 # (4, N)
    if n_pad > N:
        tok_stack = jnp.pad(tok_stack, ((0, 0), (0, n_pad - N)))
    tok_k = tok_stack.reshape(4, r_total, LANES)

    kernel = functools.partial(
        _rna_loss_kernel, n_tokens=N, num_inner=num_inner,
        strips_per_block=strips_per_block, num_pos=P, num_coord=C,
        clean_coords=not assume_finite_coords)

    chan_map = lambda o, i: (0, o * num_inner + i, 0)

    out = pl.pallas_call(
        kernel,
        out_shape=jax.ShapeDtypeStruct((num_split, 8, 128), jnp.float32),
        grid=(num_split, num_inner),
        in_specs=[
            pl.BlockSpec((P * C, block_rows, LANES), chan_map),   # coords_pred channels
            pl.BlockSpec((NC, block_rows, LANES), chan_map),      # resname logits
            pl.BlockSpec((4, block_rows, LANES), chan_map),       # packed token planes
        ],
        out_specs=pl.BlockSpec((1, 8, 128), lambda o, i: (o, 0, 0)),
        scratch_shapes=[pltpu.VMEM((4, STRIP_ROWS, LANES), jnp.float32)],
        compiler_params=pltpu.CompilerParams(
            dimension_semantics=("parallel", "arbitrary"),
            vmem_limit_bytes=vmem_limit),
    )(coords_k, logits_k, tok_k)

    # ---- tiny scalar epilogue (combines the per-chunk partials) -------------------------
    parts = jnp.sum(out, axis=0)
    mask_sum = parts[0, 0]
    ce_sum = parts[0, 1]
    rsq_sum = parts[0, 2]
    cov_sum = parts[0, 3]

    # Exact reference behaviour for multi-element coords: the exception path zeroes it.
    coord_loss = jnp.float32(0.0)
    resname_loss = jnp.where(mask_sum > 0.0, ce_sum / mask_sum, 0.0)
    resid_loss = jnp.where(mask_sum > 0.0, rsq_sum / mask_sum, 0.0)
    if P > 1:
        coverage_loss = cov_sum / (float(N) * (P * (P - 1) / 2.0))
    else:
        coverage_loss = jnp.float32(0.0)

    _nn = lambda x: jnp.nan_to_num(x, nan=0.0, posinf=0.0, neginf=0.0)
    resname_loss = _nn(resname_loss)
    resid_loss = _nn(resid_loss)
    coverage_loss = _nn(coverage_loss)

    total_loss = (coord_weight * coord_loss + resname_weight * resname_loss
                  + resid_weight * resid_loss + coverage_weight * coverage_loss)
    return {
        'total_loss': total_loss,
        'coord_loss': coord_loss,
        'resname_loss': resname_loss,
        'resid_loss': resid_loss,
        'coverage_loss': coverage_loss,
    }


def _reference_jax(coords_pred, resname_logits, resid_pred, resname_target,
                   resid_target, mask, coord_weight=1.0, resname_weight=0.5,
                   resid_weight=0.5, coverage_weight=0.1):
    """Pure-JAX transcription of the PyTorch forward (4D multi-element coords path)."""
    cp = jnp.where(jnp.abs(coords_pred) < jnp.inf, coords_pred, 0.0)
    mask_sum = mask.sum()
    logp = jax.nn.log_softmax(resname_logits, axis=-1)
    tgt = jnp.clip(resname_target, 0, resname_logits.shape[-1] - 1)
    ce = -jnp.take_along_axis(logp, tgt[..., None], axis=-1)[..., 0]
    resname = jnp.where(mask_sum > 0, (ce * mask).sum() / mask_sum, 0.0)
    resid = jnp.where(mask_sum > 0,
                      (((resid_pred - resid_target) ** 2) * mask).sum() / mask_sum, 0.0)
    P = cp.shape[2]
    cov = jnp.float32(0.0)
    if P > 1:
        for i in range(P):
            for j in range(i + 1, P):
                d = ((cp[:, :, i] - cp[:, :, j]) ** 2).sum(-1)
                cov = cov + jnp.exp(-jnp.clip(d, 1e-6, 50.0)).mean()
        cov = cov / (P * (P - 1) / 2.0)
    nn = lambda x: jnp.nan_to_num(x, nan=0.0, posinf=0.0, neginf=0.0)
    resname, resid, cov = nn(resname), nn(resid), nn(cov)
    total = resname_weight * resname + resid_weight * resid + coverage_weight * cov
    return {'total_loss': total, 'coord_loss': jnp.float32(0.0),
            'resname_loss': resname, 'resid_loss': resid, 'coverage_loss': cov}


def _run_case(key, B, S, P, C, NC):
    k1, k2, k3, k4, k5 = jax.random.split(key, 5)
    coords_pred = jax.random.normal(k1, (B, S, P, C), jnp.float32)
    coords_target = jax.random.normal(k2, (B, S, P, C), jnp.float32)
    # mark the last position of every residue as "missing" (only exercises the
    # reference's dead coord_loss path; ignored by this kernel)
    missing = (jnp.arange(P) == P - 1)[None, None, :, None]
    coords_target = jnp.where(missing, jnp.float32(NEG_FILL), coords_target)

    resname_logits = jax.random.normal(k3, (B, S, NC), jnp.float32)
    resname_target = jax.random.randint(k4, (B, S), 0, NC, jnp.int32)
    resid_pred = jax.random.normal(k5, (B, S), jnp.float32)
    resid_target = jnp.broadcast_to(jnp.arange(S, dtype=jnp.float32)[None, :], (B, S))

    mask = jnp.broadcast_to((jnp.arange(S) < S - 2).astype(jnp.float32), (B, S))
    output_mask = jnp.ones((B, S, P), jnp.float32)

    losses = rna_structure_loss(
        predictions={'coords_pred': coords_pred,
                     'resname_logits': resname_logits,
                     'resid_pred': resid_pred},
        targets={'coords': coords_target,
                 'resnames': resname_target,
                 'resids': resid_target},
        mask=mask, output_mask=output_mask)
    jax.block_until_ready(losses)

    ref = _reference_jax(coords_pred, resname_logits, resid_pred,
                         resname_target, resid_target, mask)
    for k in ('total_loss', 'coord_loss', 'resname_loss', 'resid_loss', 'coverage_loss'):
        a = float(losses[k]); b = float(ref[k])
        assert abs(a - b) <= 1e-4 * (1.0 + abs(b)), (k, a, b)


if __name__ == "__main__":
    key = jax.random.PRNGKey(0)
    ka, kb = jax.random.split(key, 2)

    # Small canonical shape: batch=2, seq=8, 4 positions/residue, 3 coords, 4 bases.
    _run_case(ka, B=2, S=8, P=4, C=3, NC=4)
    # Multi-strip case with a padded tail (exercises the in-kernel strip loop).
    _run_case(kb, B=2, S=3000, P=4, C=3, NC=4)

    print("KERNEL_OK")
</pallas_src>

<mosaic_0001>
module attributes {stable_mosaic.version = 11 : i64} {
  func.func @_rna_loss_kernel(%arg0: i32, %arg1: i32, %arg2: memref<12x8x256xf32, #tpu.memory_space<vmem>>, %arg3: memref<4x8x256xf32, #tpu.memory_space<vmem>>, %arg4: memref<4x8x256xf32, #tpu.memory_space<vmem>>, %arg5: memref<1x8x128xf32, #tpu.memory_space<vmem>>, %arg6: memref<4x8x256xf32, #tpu.memory_space<vmem>>) attributes {dimension_semantics = [#tpu.dimension_semantics<parallel>, #tpu.dimension_semantics<arbitrary>], iteration_bounds = array<i64: 1, 1>, scalar_prefetch = 0 : i64, scratch_operands = 1 : i64, tpu.core_type = #tpu.core_type<tc>, window_params = [{transform_indices = @transform_0, window_bounds = array<i64: 12, 8, 256>}, {transform_indices = @transform_1, window_bounds = array<i64: 4, 8, 256>}, {transform_indices = @transform_2, window_bounds = array<i64: 4, 8, 256>}, {transform_indices = @transform_3, window_bounds = array<i64: 1, 8, 128>}]} {
    %c1_i32 = arith.constant 1 : i32
    %0 = arith.muli %arg0, %c1_i32 : i32
    %1 = arith.addi %0, %arg1 : i32
    %c0_i32 = arith.constant 0 : i32
    %2 = arith.cmpi eq, %arg1, %c0_i32 : i32
    %3 = arith.extui %2 : i1 to i32
    %c0_i32_0 = arith.constant 0 : i32
    %4 = arith.cmpi ne, %3, %c0_i32_0 : i32
    scf.if %4 {
      %cst_112 = arith.constant 0.000000e+00 : f32
      %317 = vector.broadcast %cst_112 : f32 to vector<4x8x256xf32>
      %c0_113 = arith.constant 0 : index
      %c0_114 = arith.constant 0 : index
      %c0_115 = arith.constant 0 : index
      %318 = vector.load %arg6[%c0_113, %c0_114, %c0_115] : memref<4x8x256xf32, #tpu.memory_space<vmem>>, vector<4x8x256xf32>
      tpu.vector_store %arg6[%c0_113, %c0_114, %c0_115], %317 {strides = array<i32>} : memref<4x8x256xf32, #tpu.memory_space<vmem>>, vector<4x8x256xf32>,
    } else {
    }
    %c2048_i32 = arith.constant 2048 : i32
    %5 = arith.muli %1, %c2048_i32 : i32
    %6 = tpu.iota {dimensions = array<i32: 0>} : vector<8x256xi32>
    %7 = tpu.iota {dimensions = array<i32: 1>} : vector<8x256xi32>
    %c256_i32 = arith.constant 256 : i32
    %8 = vector.broadcast %c256_i32 : i32 to vector<8x256xi32>
    %9 = arith.muli %6, %8 : vector<8x256xi32>
    %10 = arith.addi %9, %7 : vector<8x256xi32>
    %cst = arith.constant 0.000000e+00 : f32
    %11 = vector.broadcast %cst : f32 to vector<8x256xf32>
    %c0_i32_1 = arith.constant 0 : i32
    %c8_i32 = arith.constant 8 : i32
    %12 = arith.muli %c0_i32_1, %c8_i32 : i32
    %13 = tpu.assume_multiple %12, 8 : i32
    %c0 = arith.constant 0 : index
    %14 = arith.index_cast %13 : i32 to index
    %c0_2 = arith.constant 0 : index
    %15 = vector.load %arg4[%c0, %14, %c0_2] : memref<4x8x256xf32, #tpu.memory_space<vmem>>, vector<1x8x256xf32>
    %16 = vector.shape_cast %15 : vector<1x8x256xf32> to vector<8x256xf32>
    %c1 = arith.constant 1 : index
    %17 = arith.index_cast %13 : i32 to index
    %c0_3 = arith.constant 0 : index
    %18 = vector.load %arg4[%c1, %17, %c0_3] : memref<4x8x256xf32, #tpu.memory_space<vmem>>, vector<1x8x256xf32>
    %19 = vector.shape_cast %18 : vector<1x8x256xf32> to vector<8x256xf32>
    %c2 = arith.constant 2 : index
    %20 = arith.index_cast %13 : i32 to index
    %c0_4 = arith.constant 0 : index
    %21 = vector.load %arg4[%c2, %20, %c0_4] : memref<4x8x256xf32, #tpu.memory_space<vmem>>, vector<1x8x256xf32>
    %22 = vector.shape_cast %21 : vector<1x8x256xf32> to vector<8x256xf32>
    %c3 = arith.constant 3 : index
    %23 = arith.index_cast %13 : i32 to index
    %c0_5 = arith.constant 0 : index
    %24 = vector.load %arg4[%c3, %23, %c0_5] : memref<4x8x256xf32, #tpu.memory_space<vmem>>, vector<1x8x256xf32>
    %25 = vector.shape_cast %24 : vector<1x8x256xf32> to vector<8x256xf32>
    %c0_6 = arith.constant 0 : index
    %26 = arith.index_cast %13 : i32 to index
    %c0_7 = arith.constant 0 : index
    %27 = vector.load %arg3[%c0_6, %26, %c0_7] : memref<4x8x256xf32, #tpu.memory_space<vmem>>, vector<1x8x256xf32>
    %28 = vector.shape_cast %27 : vector<1x8x256xf32> to vector<8x256xf32>
    %c1_8 = arith.constant 1 : index
    %29 = arith.index_cast %13 : i32 to index
    %c0_9 = arith.constant 0 : index
    %30 = vector.load %arg3[%c1_8, %29, %c0_9] : memref<4x8x256xf32, #tpu.memory_space<vmem>>, vector<1x8x256xf32>
    %31 = vector.shape_cast %30 : vector<1x8x256xf32> to vector<8x256xf32>
    %c2_10 = arith.constant 2 : index
    %32 = arith.index_cast %13 : i32 to index
    %c0_11 = arith.constant 0 : index
    %33 = vector.load %arg3[%c2_10, %32, %c0_11] : memref<4x8x256xf32, #tpu.memory_space<vmem>>, vector<1x8x256xf32>
    %34 = vector.shape_cast %33 : vector<1x8x256xf32> to vector<8x256xf32>
    %c3_12 = arith.constant 3 : index
    %35 = arith.index_cast %13 : i32 to index
    %c0_13 = arith.constant 0 : index
    %36 = vector.load %arg3[%c3_12, %35, %c0_13] : memref<4x8x256xf32, #tpu.memory_space<vmem>>, vector<1x8x256xf32>
    %37 = vector.shape_cast %36 : vector<1x8x256xf32> to vector<8x256xf32>
    %38 = arith.maximumf %28, %31 : vector<8x256xf32>
    %39 = arith.maximumf %38, %34 : vector<8x256xf32>
    %40 = arith.maximumf %39, %37 : vector<8x256xf32>
    %41 = arith.subf %28, %40 : vector<8x256xf32>
    %42 = math.exp %41 : vector<8x256xf32>
    %43 = arith.subf %31, %40 : vector<8x256xf32>
    %44 = math.exp %43 : vector<8x256xf32>
    %45 = arith.addf %42, %44 : vector<8x256xf32>
    %46 = arith.subf %34, %40 : vector<8x256xf32>
    %47 = math.exp %46 : vector<8x256xf32>
    %48 = arith.addf %45, %47 : vector<8x256xf32>
    %49 = arith.subf %37, %40 : vector<8x256xf32>
    %50 = math.exp %49 : vector<8x256xf32>
    %51 = arith.addf %48, %50 : vector<8x256xf32>
    %52 = math.log %51 : vector<8x256xf32>
    %53 = arith.addf %40, %52 : vector<8x256xf32>
    %cst_14 = arith.constant 0.000000e+00 : f32
    %cst_15 = arith.constant 3.000000e+00 : f32
    %54 = vector.broadcast %cst_14 : f32 to vector<8x256xf32>
    %55 = arith.maximumf %54, %25 : vector<8x256xf32>
    %56 = vector.broadcast %cst_15 : f32 to vector<8x256xf32>
    %57 = arith.minimumf %56, %55 : vector<8x256xf32>
    %cst_16 = arith.constant 2.000000e+00 : f32
    %58 = vector.broadcast %cst_16 : f32 to vector<8x256xf32>
    %59 = arith.cmpf oeq, %57, %58 : vector<8x256xf32>
    %60 = arith.select %59, %34, %37 : vector<8x256xi1>, vector<8x256xf32>
    %cst_17 = arith.constant 1.000000e+00 : f32
    %61 = vector.broadcast %cst_17 : f32 to vector<8x256xf32>
    %62 = arith.cmpf oeq, %57, %61 : vector<8x256xf32>
    %63 = arith.select %62, %31, %60 : vector<8x256xi1>, vector<8x256xf32>
    %cst_18 = arith.constant 0.000000e+00 : f32
    %64 = vector.broadcast %cst_18 : f32 to vector<8x256xf32>
    %65 = arith.cmpf oeq, %57, %64 : vector<8x256xf32>
    %66 = arith.select %65, %28, %63 : vector<8x256xi1>, vector<8x256xf32>
    %67 = arith.subf %53, %66 : vector<8x256xf32>
    %68 = arith.subf %19, %22 : vector<8x256xf32>
    %69 = arith.mulf %68, %68 : vector<8x256xf32>
    %70 = arith.addf %11, %16 : vector<8x256xf32>
    %71 = arith.mulf %67, %16 : vector<8x256xf32>
    %72 = arith.addf %11, %71 : vector<8x256xf32>
    %73 = arith.mulf %69, %16 : vector<8x256xf32>
    %74 = arith.addf %11, %73 : vector<8x256xf32>
    %c2048_i32_19 = arith.constant 2048 : i32
    %75 = arith.muli %c0_i32_1, %c2048_i32_19 : i32
    %76 = arith.addi %5, %75 : i32
    %77 = vector.broadcast %76 : i32 to vector<8x256xi32>
    %78 = arith.addi %77, %10 : vector<8x256xi32>
    %c16_i32 = arith.constant 16 : i32
    %79 = vector.broadcast %c16_i32 : i32 to vector<8x256xi32>
    %80 = arith.cmpi slt, %78, %79 : vector<8x256xi32>
    %81 = arith.extui %80 : vector<8x256xi1> to vector<8x256xi32>
    %82 = arith.sitofp %81 : vector<8x256xi32> to vector<8x256xf32>
    %c0_20 = arith.constant 0 : index
    %83 = arith.index_cast %13 : i32 to index
    %c0_21 = arith.constant 0 : index
    %84 = vector.load %arg2[%c0_20, %83, %c0_21] : memref<12x8x256xf32, #tpu.memory_space<vmem>>, vector<1x8x256xf32>
    %85 = vector.shape_cast %84 : vector<1x8x256xf32> to vector<8x256xf32>
    %86 = math.absf %85 : vector<8x256xf32>
    %cst_22 = arith.constant 0x7F800000 : f32
    %87 = vector.broadcast %cst_22 : f32 to vector<8x256xf32>
    %88 = arith.cmpf olt, %86, %87 : vector<8x256xf32>
    %cst_23 = arith.constant 0.000000e+00 : f32
    %89 = vector.broadcast %cst_23 : f32 to vector<8x256xf32>
    %90 = arith.select %88, %85, %89 : vector<8x256xi1>, vector<8x256xf32>
    %c1_24 = arith.constant 1 : index
    %91 = arith.index_cast %13 : i32 to index
    %c0_25 = arith.constant 0 : index
    %92 = vector.load %arg2[%c1_24, %91, %c0_25] : memref<12x8x256xf32, #tpu.memory_space<vmem>>, vector<1x8x256xf32>
    %93 = vector.shape_cast %92 : vector<1x8x256xf32> to vector<8x256xf32>
    %94 = math.absf %93 : vector<8x256xf32>
    %cst_26 = arith.constant 0x7F800000 : f32
    %95 = vector.broadcast %cst_26 : f32 to vector<8x256xf32>
    %96 = arith.cmpf olt, %94, %95 : vector<8x256xf32>
    %cst_27 = arith.constant 0.000000e+00 : f32
    %97 = vector.broadcast %cst_27 : f32 to vector<8x256xf32>
    %98 = arith.select %96, %93, %97 : vector<8x256xi1>, vector<8x256xf32>
    %c2_28 = arith.constant 2 : index
    %99 = arith.index_cast %13 : i32 to index
    %c0_29 = arith.constant 0 : index
    %100 = vector.load %arg2[%c2_28, %99, %c0_29] : memref<12x8x256xf32, #tpu.memory_space<vmem>>, vector<1x8x256xf32>
    %101 = vector.shape_cast %100 : vector<1x8x256xf32> to vector<8x256xf32>
    %102 = math.absf %101 : vector<8x256xf32>
    %cst_30 = arith.constant 0x7F800000 : f32
    %103 = vector.broadcast %cst_30 : f32 to vector<8x256xf32>
    %104 = arith.cmpf olt, %102, %103 : vector<8x256xf32>
    %cst_31 = arith.constant 0.000000e+00 : f32
    %105 = vector.broadcast %cst_31 : f32 to vector<8x256xf32>
    %106 = arith.select %104, %101, %105 : vector<8x256xi1>, vector<8x256xf32>
    %c3_32 = arith.constant 3 : index
    %107 = arith.index_cast %13 : i32 to index
    %c0_33 = arith.constant 0 : index
    %108 = vector.load %arg2[%c3_32, %107, %c0_33] : memref<12x8x256xf32, #tpu.memory_space<vmem>>, vector<1x8x256xf32>
    %109 = vector.shape_cast %108 : vector<1x8x256xf32> to vector<8x256xf32>
    %110 = math.absf %109 : vector<8x256xf32>
    %cst_34 = arith.constant 0x7F800000 : f32
    %111 = vector.broadcast %cst_34 : f32 to vector<8x256xf32>
    %112 = arith.cmpf olt, %110, %111 : vector<8x256xf32>
    %cst_35 = arith.constant 0.000000e+00 : f32
    %113 = vector.broadcast %cst_35 : f32 to vector<8x256xf32>
    %114 = arith.select %112, %109, %113 : vector<8x256xi1>, vector<8x256xf32>
    %c4 = arith.constant 4 : index
    %115 = arith.index_cast %13 : i32 to index
    %c0_36 = arith.constant 0 : index
    %116 = vector.load %arg2[%c4, %115, %c0_36] : memref<12x8x256xf32, #tpu.memory_space<vmem>>, vector<1x8x256xf32>
    %117 = vector.shape_cast %116 : vector<1x8x256xf32> to vector<8x256xf32>
    %118 = math.absf %117 : vector<8x256xf32>
    %cst_37 = arith.constant 0x7F800000 : f32
    %119 = vector.broadcast %cst_37 : f32 to vector<8x256xf32>
    %120 = arith.cmpf olt, %118, %119 : vector<8x256xf32>
    %cst_38 = arith.constant 0.000000e+00 : f32
    %121 = vector.broadcast %cst_38 : f32 to vector<8x256xf32>
    %122 = arith.select %120, %117, %121 : vector<8x256xi1>, vector<8x256xf32>
    %c5 = arith.constant 5 : index
    %123 = arith.index_cast %13 : i32 to index
    %c0_39 = arith.constant 0 : index
    %124 = vector.load %arg2[%c5, %123, %c0_39] : memref<12x8x256xf32, #tpu.memory_space<vmem>>, vector<1x8x256xf32>
    %125 = vector.shape_cast %124 : vector<1x8x256xf32> to vector<8x256xf32>
    %126 = math.absf %125 : vector<8x256xf32>
    %cst_40 = arith.constant 0x7F800000 : f32
    %127 = vector.broadcast %cst_40 : f32 to vector<8x256xf32>
    %128 = arith.cmpf olt, %126, %127 : vector<8x256xf32>
    %cst_41 = arith.constant 0.000000e+00 : f32
    %129 = vector.broadcast %cst_41 : f32 to vector<8x256xf32>
    %130 = arith.select %128, %125, %129 : vector<8x256xi1>, vector<8x256xf32>
    %c6 = arith.constant 6 : index
    %131 = arith.index_cast %13 : i32 to index
    %c0_42 = arith.constant 0 : index
    %132 = vector.load %arg2[%c6, %131, %c0_42] : memref<12x8x256xf32, #tpu.memory_space<vmem>>, vector<1x8x256xf32>
    %133 = vector.shape_cast %132 : vector<1x8x256xf32> to vector<8x256xf32>
    %134 = math.absf %133 : vector<8x256xf32>
    %cst_43 = arith.constant 0x7F800000 : f32
    %135 = vector.broadcast %cst_43 : f32 to vector<8x256xf32>
    %136 = arith.cmpf olt, %134, %135 : vector<8x256xf32>
    %cst_44 = arith.constant 0.000000e+00 : f32
    %137 = vector.broadcast %cst_44 : f32 to vector<8x256xf32>
    %138 = arith.select %136, %133, %137 : vector<8x256xi1>, vector<8x256xf32>
    %c7 = arith.constant 7 : index
    %139 = arith.index_cast %13 : i32 to index
    %c0_45 = arith.constant 0 : index
    %140 = vector.load %arg2[%c7, %139, %c0_45] : memref<12x8x256xf32, #tpu.memory_space<vmem>>, vector<1x8x256xf32>
    %141 = vector.shape_cast %140 : vector<1x8x256xf32> to vector<8x256xf32>
    %142 = math.absf %141 : vector<8x256xf32>
    %cst_46 = arith.constant 0x7F800000 : f32
    %143 = vector.broadcast %cst_46 : f32 to vector<8x256xf32>
    %144 = arith.cmpf olt, %142, %143 : vector<8x256xf32>
    %cst_47 = arith.constant 0.000000e+00 : f32
    %145 = vector.broadcast %cst_47 : f32 to vector<8x256xf32>
    %146 = arith.select %144, %141, %145 : vector<8x256xi1>, vector<8x256xf32>
    %c8 = arith.constant 8 : index
    %147 = arith.index_cast %13 : i32 to index
    %c0_48 = arith.constant 0 : index
    %148 = vector.load %arg2[%c8, %147, %c0_48] : memref<12x8x256xf32, #tpu.memory_space<vmem>>, vector<1x8x256xf32>
    %149 = vector.shape_cast %148 : vector<1x8x256xf32> to vector<8x256xf32>
    %150 = math.absf %149 : vector<8x256xf32>
    %cst_49 = arith.constant 0x7F800000 : f32
    %151 = vector.broadcast %cst_49 : f32 to vector<8x256xf32>
    %152 = arith.cmpf olt, %150, %151 : vector<8x256xf32>
    %cst_50 = arith.constant 0.000000e+00 : f32
    %153 = vector.broadcast %cst_50 : f32 to vector<8x256xf32>
    %154 = arith.select %152, %149, %153 : vector<8x256xi1>, vector<8x256xf32>
    %c9 = arith.constant 9 : index
    %155 = arith.index_cast %13 : i32 to index
    %c0_51 = arith.constant 0 : index
    %156 = vector.load %arg2[%c9, %155, %c0_51] : memref<12x8x256xf32, #tpu.memory_space<vmem>>, vector<1x8x256xf32>
    %157 = vector.shape_cast %156 : vector<1x8x256xf32> to vector<8x256xf32>
    %158 = math.absf %157 : vector<8x256xf32>
    %cst_52 = arith.constant 0x7F800000 : f32
    %159 = vector.broadcast %cst_52 : f32 to vector<8x256xf32>
    %160 = arith.cmpf olt, %158, %159 : vector<8x256xf32>
    %cst_53 = arith.constant 0.000000e+00 : f32
    %161 = vector.broadcast %cst_53 : f32 to vector<8x256xf32>
    %162 = arith.select %160, %157, %161 : vector<8x256xi1>, vector<8x256xf32>
    %c10 = arith.constant 10 : index
    %163 = arith.index_cast %13 : i32 to index
    %c0_54 = arith.constant 0 : index
    %164 = vector.load %arg2[%c10, %163, %c0_54] : memref<12x8x256xf32, #tpu.memory_space<vmem>>, vector<1x8x256xf32>
    %165 = vector.shape_cast %164 : vector<1x8x256xf32> to vector<8x256xf32>
    %166 = math.absf %165 : vector<8x256xf32>
    %cst_55 = arith.constant 0x7F800000 : f32
    %167 = vector.broadcast %cst_55 : f32 to vector<8x256xf32>
    %168 = arith.cmpf olt, %166, %167 : vector<8x256xf32>
    %cst_56 = arith.constant 0.000000e+00 : f32
    %169 = vector.broadcast %cst_56 : f32 to vector<8x256xf32>
    %170 = arith.select %168, %165, %169 : vector<8x256xi1>, vector<8x256xf32>
    %c11 = arith.constant 11 : index
    %171 = arith.index_cast %13 : i32 to index
    %c0_57 = arith.constant 0 : index
    %172 = vector.load %arg2[%c11, %171, %c0_57] : memref<12x8x256xf32, #tpu.memory_space<vmem>>, vector<1x8x256xf32>
    %173 = vector.shape_cast %172 : vector<1x8x256xf32> to vector<8x256xf32>
    %174 = math.absf %173 : vector<8x256xf32>
    %cst_58 = arith.constant 0x7F800000 : f32
    %175 = vector.broadcast %cst_58 : f32 to vector<8x256xf32>
    %176 = arith.cmpf olt, %174, %175 : vector<8x256xf32>
    %cst_59 = arith.constant 0.000000e+00 : f32
    %177 = vector.broadcast %cst_59 : f32 to vector<8x256xf32>
    %178 = arith.select %176, %173, %177 : vector<8x256xi1>, vector<8x256xf32>
    %cst_60 = arith.constant 0.000000e+00 : f32
    %179 = vector.broadcast %cst_60 : f32 to vector<8x256xf32>
    %cst_61 = arith.constant 0.000000e+00 : f32
    %180 = vector.broadcast %cst_61 : f32 to vector<8x256xf32>
    %181 = arith.subf %90, %114 : vector<8x256xf32>
    %182 = arith.mulf %181, %181 : vector<8x256xf32>
    %183 = arith.addf %180, %182 : vector<8x256xf32>
    %184 = arith.subf %98, %122 : vector<8x256xf32>
    %185 = arith.mulf %184, %184 : vector<8x256xf32>
    %186 = arith.addf %183, %185 : vector<8x256xf32>
    %187 = arith.subf %106, %130 : vector<8x256xf32>
    %188 = arith.mulf %187, %187 : vector<8x256xf32>
    %189 = arith.addf %186, %188 : vector<8x256xf32>
    %cst_62 = arith.constant 9.99999997E-7 : f32
    %cst_63 = arith.constant 5.000000e+01 : f32
    %190 = vector.broadcast %cst_62 : f32 to vector<8x256xf32>
    %191 = arith.maximumf %190, %189 : vector<8x256xf32>
    %192 = vector.broadcast %cst_63 : f32 to vector<8x256xf32>
    %193 = arith.minimumf %192, %191 : vector<8x256xf32>
    %cst_64 = arith.constant 0.000000e+00 : f32
    %194 = vector.broadcast %cst_64 : f32 to vector<8x256xf32>
    %195 = arith.subf %194, %193 : vector<8x256xf32>
    %196 = math.exp %195 : vector<8x256xf32>
    %197 = arith.addf %179, %196 : vector<8x256xf32>
    %cst_65 = arith.constant 0.000000e+00 : f32
    %198 = vector.broadcast %cst_65 : f32 to vector<8x256xf32>
    %199 = arith.subf %90, %138 : vector<8x256xf32>
    %200 = arith.mulf %199, %199 : vector<8x256xf32>
    %201 = arith.addf %198, %200 : vector<8x256xf32>
    %202 = arith.subf %98, %146 : vector<8x256xf32>
    %203 = arith.mulf %202, %202 : vector<8x256xf32>
    %204 = arith.addf %201, %203 : vector<8x256xf32>
    %205 = arith.subf %106, %154 : vector<8x256xf32>
    %206 = arith.mulf %205, %205 : vector<8x256xf32>
    %207 = arith.addf %204, %206 : vector<8x256xf32>
    %cst_66 = arith.constant 9.99999997E-7 : f32
    %cst_67 = arith.constant 5.000000e+01 : f32
    %208 = vector.broadcast %cst_66 : f32 to vector<8x256xf32>
    %209 = arith.maximumf %208, %207 : vector<8x256xf32>
    %210 = vector.broadcast %cst_67 : f32 to vector<8x256xf32>
    %211 = arith.minimumf %210, %209 : vector<8x256xf32>
    %cst_68 = arith.constant 0.000000e+00 : f32
    %212 = vector.broadcast %cst_68 : f32 to vector<8x256xf32>
    %213 = arith.subf %212, %211 : vector<8x256xf32>
    %214 = math.exp %213 : vector<8x256xf32>
    %215 = arith.addf %197, %214 : vector<8x256xf32>
    %cst_69 = arith.constant 0.000000e+00 : f32
    %216 = vector.broadcast %cst_69 : f32 to vector<8x256xf32>
    %217 = arith.subf %90, %162 : vector<8x256xf32>
    %218 = arith.mulf %217, %217 : vector<8x256xf32>
    %219 = arith.addf %216, %218 : vector<8x256xf32>
    %220 = arith.subf %98, %170 : vector<8x256xf32>
    %221 = arith.mulf %220, %220 : vector<8x256xf32>
    %222 = arith.addf %219, %221 : vector<8x256xf32>
    %223 = arith.subf %106, %178 : vector<8x256xf32>
    %224 = arith.mulf %223, %223 : vector<8x256xf32>
    %225 = arith.addf %222, %224 : vector<8x256xf32>
    %cst_70 = arith.constant 9.99999997E-7 : f32
    %cst_71 = arith.constant 5.000000e+01 : f32
    %226 = vector.broadcast %cst_70 : f32 to vector<8x256xf32>
    %227 = arith.maximumf %226, %225 : vector<8x256xf32>
    %228 = vector.broadcast %cst_71 : f32 to vector<8x256xf32>
    %229 = arith.minimumf %228, %227 : vector<8x256xf32>
    %cst_72 = arith.constant 0.000000e+00 : f32
    %230 = vector.broadcast %cst_72 : f32 to vector<8x256xf32>
    %231 = arith.subf %230, %229 : vector<8x256xf32>
    %232 = math.exp %231 : vector<8x256xf32>
    %233 = arith.addf %215, %232 : vector<8x256xf32>
    %cst_73 = arith.constant 0.000000e+00 : f32
    %234 = vector.broadcast %cst_73 : f32 to vector<8x256xf32>
    %235 = arith.subf %114, %138 : vector<8x256xf32>
    %236 = arith.mulf %235, %235 : vector<8x256xf32>
    %237 = arith.addf %234, %236 : vector<8x256xf32>
    %238 = arith.subf %122, %146 : vector<8x256xf32>
    %239 = arith.mulf %238, %238 : vector<8x256xf32>
    %240 = arith.addf %237, %239 : vector<8x256xf32>
    %241 = arith.subf %130, %154 : vector<8x256xf32>
    %242 = arith.mulf %241, %241 : vector<8x256xf32>
    %243 = arith.addf %240, %242 : vector<8x256xf32>
    %cst_74 = arith.constant 9.99999997E-7 : f32
    %cst_75 = arith.constant 5.000000e+01 : f32
    %244 = vector.broadcast %cst_74 : f32 to vector<8x256xf32>
    %245 = arith.maximumf %244, %243 : vector<8x256xf32>
    %246 = vector.broadcast %cst_75 : f32 to vector<8x256xf32>
    %247 = arith.minimumf %246, %245 : vector<8x256xf32>
    %cst_76 = arith.constant 0.000000e+00 : f32
    %248 = vector.broadcast %cst_76 : f32 to vector<8x256xf32>
    %249 = arith.subf %248, %247 : vector<8x256xf32>
    %250 = math.exp %249 : vector<8x256xf32>
    %251 = arith.addf %233, %250 : vector<8x256xf32>
    %cst_77 = arith.constant 0.000000e+00 : f32
    %252 = vector.broadcast %cst_77 : f32 to vector<8x256xf32>
    %253 = arith.subf %114, %162 : vector<8x256xf32>
    %254 = arith.mulf %253, %253 : vector<8x256xf32>
    %255 = arith.addf %252, %254 : vector<8x256xf32>
    %256 = arith.subf %122, %170 : vector<8x256xf32>
    %257 = arith.mulf %256, %256 : vector<8x256xf32>
    %258 = arith.addf %255, %257 : vector<8x256xf32>
    %259 = arith.subf %130, %178 : vector<8x256xf32>
    %260 = arith.mulf %259, %259 : vector<8x256xf32>
    %261 = arith.addf %258, %260 : vector<8x256xf32>
    %cst_78 = arith.constant 9.99999997E-7 : f32
    %cst_79 = arith.constant 5.000000e+01 : f32
    %262 = vector.broadcast %cst_78 : f32 to vector<8x256xf32>
    %263 = arith.maximumf %262, %261 : vector<8x256xf32>
    %264 = vector.broadcast %cst_79 : f32 to vector<8x256xf32>
    %265 = arith.minimumf %264, %263 : vector<8x256xf32>
    %cst_80 = arith.constant 0.000000e+00 : f32
    %266 = vector.broadcast %cst_80 : f32 to vector<8x256xf32>
    %267 = arith.subf %266, %265 : vector<8x256xf32>
    %268 = math.exp %267 : vector<8x256xf32>
    %269 = arith.addf %251, %268 : vector<8x256xf32>
    %cst_81 = arith.constant 0.000000e+00 : f32
    %270 = vector.broadcast %cst_81 : f32 to vector<8x256xf32>
    %271 = arith.subf %138, %162 : vector<8x256xf32>
    %272 = arith.mulf %271, %271 : vector<8x256xf32>
    %273 = arith.addf %270, %272 : vector<8x256xf32>
    %274 = arith.subf %146, %170 : vector<8x256xf32>
    %275 = arith.mulf %274, %274 : vector<8x256xf32>
    %276 = arith.addf %273, %275 : vector<8x256xf32>
    %277 = arith.subf %154, %178 : vector<8x256xf32>
    %278 = arith.mulf %277, %277 : vector<8x256xf32>
    %279 = arith.addf %276, %278 : vector<8x256xf32>
    %cst_82 = arith.constant 9.99999997E-7 : f32
    %cst_83 = arith.constant 5.000000e+01 : f32
    %280 = vector.broadcast %cst_82 : f32 to vector<8x256xf32>
    %281 = arith.maximumf %280, %279 : vector<8x256xf32>
    %282 = vector.broadcast %cst_83 : f32 to vector<8x256xf32>
    %283 = arith.minimumf %282, %281 : vector<8x256xf32>
    %cst_84 = arith.constant 0.000000e+00 : f32
    %284 = vector.broadcast %cst_84 : f32 to vector<8x256xf32>
    %285 = arith.subf %284, %283 : vector<8x256xf32>
    %286 = math.exp %285 : vector<8x256xf32>
    %287 = arith.addf %269, %286 : vector<8x256xf32>
    %288 = arith.mulf %287, %82 : vector<8x256xf32>
    %289 = arith.addf %11, %288 : vector<8x256xf32>
    %c1_i32_85 = arith.constant 1 : i32
    %c0_86 = arith.constant 0 : index
    %c0_87 = arith.constant 0 : index
    %c0_88 = arith.constant 0 : index
    %290 = vector.load %arg6[%c0_86, %c0_87, %c0_88] : memref<4x8x256xf32, #tpu.memory_space<vmem>>, vector<1x8x256xf32>
    %291 = vector.shape_cast %290 : vector<1x8x256xf32> to vector<8x256xf32>
    %292 = arith.addf %291, %70 : vector<8x256xf32>
    %c0_89 = arith.constant 0 : index
    %c0_90 = arith.constant 0 : index
    %c0_91 = arith.constant 0 : index
    %293 = vector.load %arg6[%c0_89, %c0_90, %c0_91] : memref<4x8x256xf32, #tpu.memory_space<vmem>>, vector<1x8x256xf32>
    %294 = vector.shape_cast %293 : vector<1x8x256xf32> to vector<8x256xf32>
    %295 = vector.shape_cast %292 : vector<8x256xf32> to vector<1x8x256xf32>
    tpu.vector_store %arg6[%c0_89, %c0_90, %c0_91], %295 {strides = array<i32>} : memref<4x8x256xf32, #tpu.memory_space<vmem>>, vector<1x8x256xf32>,
    %c1_92 = arith.constant 1 : index
    %c0_93 = arith.constant 0 : index
    %c0_94 = arith.constant 0 : index
    %296 = vector.load %arg6[%c1_92, %c0_93, %c0_94] : memref<4x8x256xf32, #tpu.memory_space<vmem>>, vector<1x8x256xf32>
    %297 = vector.shape_cast %296 : vector<1x8x256xf32> to vector<8x256xf32>
    %298 = arith.addf %297, %72 : vector<8x256xf32>
    %c1_95 = arith.constant 1 : index
    %c0_96 = arith.constant 0 : index
    %c0_97 = arith.constant 0 : index
    %299 = vector.load %arg6[%c1_95, %c0_96, %c0_97] : memref<4x8x256xf32, #tpu.memory_space<vmem>>, vector<1x8x256xf32>
    %300 = vector.shape_cast %299 : vector<1x8x256xf32> to vector<8x256xf32>
    %301 = vector.shape_cast %298 : vector<8x256xf32> to vector<1x8x256xf32>
    tpu.vector_store %arg6[%c1_95, %c0_96, %c0_97], %301 {strides = array<i32>} : memref<4x8x256xf32, #tpu.memory_space<vmem>>, vector<1x8x256xf32>,
    %c2_98 = arith.constant 2 : index
    %c0_99 = arith.constant 0 : index
    %c0_100 = arith.constant 0 : index
    %302 = vector.load %arg6[%c2_98, %c0_99, %c0_100] : memref<4x8x256xf32, #tpu.memory_space<vmem>>, vector<1x8x256xf32>
    %303 = vector.shape_cast %302 : vector<1x8x256xf32> to vector<8x256xf32>
    %304 = arith.addf %303, %74 : vector<8x256xf32>
    %c2_101 = arith.constant 2 : index
    %c0_102 = arith.constant 0 : index
    %c0_103 = arith.constant 0 : index
    %305 = vector.load %arg6[%c2_101, %c0_102, %c0_103] : memref<4x8x256xf32, #tpu.memory_space<vmem>>, vector<1x8x256xf32>
    %306 = vector.shape_cast %305 : vector<1x8x256xf32> to vector<8x256xf32>
    %307 = vector.shape_cast %304 : vector<8x256xf32> to vector<1x8x256xf32>
    tpu.vector_store %arg6[%c2_101, %c0_102, %c0_103], %307 {strides = array<i32>} : memref<4x8x256xf32, #tpu.memory_space<vmem>>, vector<1x8x256xf32>,
    %c3_104 = arith.constant 3 : index
    %c0_105 = arith.constant 0 : index
    %c0_106 = arith.constant 0 : index
    %308 = vector.load %arg6[%c3_104, %c0_105, %c0_106] : memref<4x8x256xf32, #tpu.memory_space<vmem>>, vector<1x8x256xf32>
    %309 = vector.shape_cast %308 : vector<1x8x256xf32> to vector<8x256xf32>
    %310 = arith.addf %309, %289 : vector<8x256xf32>
    %c3_107 = arith.constant 3 : index
    %c0_108 = arith.constant 0 : index
    %c0_109 = arith.constant 0 : index
    %311 = vector.load %arg6[%c3_107, %c0_108, %c0_109] : memref<4x8x256xf32, #tpu.memory_space<vmem>>, vector<1x8x256xf32>
    %312 = vector.shape_cast %311 : vector<1x8x256xf32> to vector<8x256xf32>
    %313 = vector.shape_cast %310 : vector<8x256xf32> to vector<1x8x256xf32>
    tpu.vector_store %arg6[%c3_107, %c0_108, %c0_109], %313 {strides = array<i32>} : memref<4x8x256xf32, #tpu.memory_space<vmem>>, vector<1x8x256xf32>,
    %c0_i32_110 = arith.constant 0 : i32
    %314 = arith.cmpi eq, %arg1, %c0_i32_110 : i32
    %315 = arith.extui %314 : i1 to i32
    %c0_i32_111 = arith.constant 0 : i32
    %316 = arith.cmpi ne, %315, %c0_i32_111 : i32
    scf.if %316 {
      %c0_112 = arith.constant 0 : index
      %c0_113 = arith.constant 0 : index
      %c0_114 = arith.constant 0 : index
      %317 = vector.load %arg6[%c0_112, %c0_113, %c0_114] : memref<4x8x256xf32, #tpu.memory_space<vmem>>, vector<1x8x256xf32>
      %318 = vector.shape_cast %317 : vector<1x8x256xf32> to vector<8x256xf32>
      %319 = vector.shape_cast %318 : vector<8x256xf32> to vector<1x8x256xf32>
      %cst_115 = arith.constant dense<0.000000e+00> : vector<1xf32>
      %320 = vector.multi_reduction <add>, %319, %cst_115 [1, 2] : vector<1x8x256xf32> to vector<1xf32>
      %321 = vector.shape_cast %320 : vector<1xf32> to vector<1x1x1xf32>
      %322 = vector.extract %321[0, 0, 0] : f32 from vector<1x1x1xf32>
      %c1_116 = arith.constant 1 : index
      %c0_117 = arith.constant 0 : index
      %c0_118 = arith.constant 0 : index
      %323 = vector.load %arg6[%c1_116, %c0_117, %c0_118] : memref<4x8x256xf32, #tpu.memory_space<vmem>>, vector<1x8x256xf32>
      %324 = vector.shape_cast %323 : vector<1x8x256xf32> to vector<8x256xf32>
      %325 = vector.shape_cast %324 : vector<8x256xf32> to vector<1x8x256xf32>
      %cst_119 = arith.constant dense<0.000000e+00> : vector<1xf32>
      %326 = vector.multi_reduction <add>, %325, %cst_119 [1, 2] : vector<1x8x256xf32> to vector<1xf32>
      %327 = vector.shape_cast %326 : vector<1xf32> to vector<1x1x1xf32>
      %328 = vector.extract %327[0, 0, 0] : f32 from vector<1x1x1xf32>
      %c2_120 = arith.constant 2 : index
      %c0_121 = arith.constant 0 : index
      %c0_122 = arith.constant 0 : index
      %329 = vector.load %arg6[%c2_120, %c0_121, %c0_122] : memref<4x8x256xf32, #tpu.memory_space<vmem>>, vector<1x8x256xf32>
      %330 = vector.shape_cast %329 : vector<1x8x256xf32> to vector<8x256xf32>
      %331 = vector.shape_cast %330 : vector<8x256xf32> to vector<1x8x256xf32>
      %cst_123 = arith.constant dense<0.000000e+00> : vector<1xf32>
      %332 = vector.multi_reduction <add>, %331, %cst_123 [1, 2] : vector<1x8x256xf32> to vector<1xf32>
      %333 = vector.shape_cast %332 : vector<1xf32> to vector<1x1x1xf32>
      %334 = vector.extract %333[0, 0, 0] : f32 from vector<1x1x1xf32>
      %c3_124 = arith.constant 3 : index
      %c0_125 = arith.constant 0 : index
      %c0_126 = arith.constant 0 : index
      %335 = vector.load %arg6[%c3_124, %c0_125, %c0_126] : memref<4x8x256xf32, #tpu.memory_space<vmem>>, vector<1x8x256xf32>
      %336 = vector.shape_cast %335 : vector<1x8x256xf32> to vector<8x256xf32>
      %337 = vector.shape_cast %336 : vector<8x256xf32> to vector<1x8x256xf32>
      %cst_127 = arith.constant dense<0.000000e+00> : vector<1xf32>
      %338 = vector.multi_reduction <add>, %337, %cst_127 [1, 2] : vector<1x8x256xf32> to vector<1xf32>
      %339 = vector.shape_cast %338 : vector<1xf32> to vector<1x1x1xf32>
      %340 = vector.extract %339[0, 0, 0] : f32 from vector<1x1x1xf32>
      %341 = tpu.iota {dimensions = array<i32: 0>} : vector<8x128xi32>
      %342 = tpu.iota {dimensions = array<i32: 1>} : vector<8x128xi32>
      %c0_i32_128 = arith.constant 0 : i32
      %343 = vector.broadcast %c0_i32_128 : i32 to vector<8x128xi32>
      %344 = arith.cmpi eq, %341, %343 : vector<8x128xi32>
      %c0_i32_129 = arith.constant 0 : i32
      %345 = vector.broadcast %c0_i32_129 : i32 to vector<8x128xi32>
      %346 = arith.cmpi eq, %342, %345 : vector<8x128xi32>
      %347 = arith.andi %344, %346 : vector<8x128xi1>
      %cst_130 = arith.constant 0.000000e+00 : f32
      %348 = vector.broadcast %322 : f32 to vector<8x128xf32>
      %349 = vector.broadcast %cst_130 : f32 to vector<8x128xf32>
      %350 = arith.select %347, %348, %349 : vector<8x128xi1>, vector<8x128xf32>
      %c0_i32_131 = arith.constant 0 : i32
      %351 = vector.broadcast %c0_i32_131 : i32 to vector<8x128xi32>
      %352 = arith.cmpi eq, %341, %351 : vector<8x128xi32>
      %c1_i32_132 = arith.constant 1 : i32
      %353 = vector.broadcast %c1_i32_132 : i32 to vector<8x128xi32>
      %354 = arith.cmpi eq, %342, %353 : vector<8x128xi32>
      %355 = arith.andi %352, %354 : vector<8x128xi1>
      %cst_133 = arith.constant 0.000000e+00 : f32
      %356 = vector.broadcast %328 : f32 to vector<8x128xf32>
      %357 = vector.broadcast %cst_133 : f32 to vector<8x128xf32>
      %358 = arith.select %355, %356, %357 : vector<8x128xi1>, vector<8x128xf32>
      %359 = arith.addf %350, %358 : vector<8x128xf32>
      %c0_i32_134 = arith.constant 0 : i32
      %360 = vector.broadcast %c0_i32_134 : i32 to vector<8x128xi32>
      %361 = arith.cmpi eq, %341, %360 : vector<8x128xi32>
      %c2_i32 = arith.constant 2 : i32
      %362 = vector.broadcast %c2_i32 : i32 to vector<8x128xi32>
      %363 = arith.cmpi eq, %342, %362 : vector<8x128xi32>
      %364 = arith.andi %361, %363 : vector<8x128xi1>
      %cst_135 = arith.constant 0.000000e+00 : f32
      %365 = vector.broadcast %334 : f32 to vector<8x128xf32>
      %366 = vector.broadcast %cst_135 : f32 to vector<8x128xf32>
      %367 = arith.select %364, %365, %366 : vector<8x128xi1>, vector<8x128xf32>
      %368 = arith.addf %359, %367 : vector<8x128xf32>
      %c0_i32_136 = arith.constant 0 : i32
      %369 = vector.broadcast %c0_i32_136 : i32 to vector<8x128xi32>
      %370 = arith.cmpi eq, %341, %369 : vector<8x128xi32>
      %c3_i32 = arith.constant 3 : i32
      %371 = vector.broadcast %c3_i32 : i32 to vector<8x128xi32>
      %372 = arith.cmpi eq, %342, %371 : vector<8x128xi32>
      %373 = arith.andi %370, %372 : vector<8x128xi1>
      %cst_137 = arith.constant 0.000000e+00 : f32
      %374 = vector.broadcast %340 : f32 to vector<8x128xf32>
      %375 = vector.broadcast %cst_137 : f32 to vector<8x128xf32>
      %376 = arith.select %373, %374, %375 : vector<8x128xi1>, vector<8x128xf32>
      %377 = arith.addf %368, %376 : vector<8x128xf32>
      %c0_138 = arith.constant 0 : index
      %c0_139 = arith.constant 0 : index
      %c0_140 = arith.constant 0 : index
      %378 = vector.load %arg5[%c0_138, %c0_139, %c0_140] : memref<1x8x128xf32, #tpu.memory_space<vmem>>, vector<1x8x128xf32>
      %379 = vector.shape_cast %378 : vector<1x8x128xf32> to vector<8x128xf32>
      %380 = vector.shape_cast %377 : vector<8x128xf32> to vector<1x8x128xf32>
      tpu.vector_store %arg5[%c0_138, %c0_139, %c0_140], %380 {strides = array<i32>} : memref<1x8x128xf32, #tpu.memory_space<vmem>>, vector<1x8x128xf32>,
    } else {
    }
    return
  }
  func.func @transform_0(%arg0: i32, %arg1: i32) -> (i32, i32, i32) {
    %c1_i32 = arith.constant 1 : i32
    %0 = arith.muli %arg0, %c1_i32 : i32
    %1 = arith.addi %0, %arg1 : i32
    %c0_i32 = arith.constant 0 : i32
    %c0_i32_0 = arith.constant 0 : i32
    %c0_i32_1 = arith.constant 0 : i32
    return %c0_i32, %1, %c0_i32_0 : i32, i32, i32
  }
  func.func @transform_1(%arg0: i32, %arg1: i32) -> (i32, i32, i32) {
    %c1_i32 = arith.constant 1 : i32
    %0 = arith.muli %arg0, %c1_i32 : i32
    %1 = arith.addi %0, %arg1 : i32
    %c0_i32 = arith.constant 0 : i32
    %c0_i32_0 = arith.constant 0 : i32
    %c0_i32_1 = arith.constant 0 : i32
    return %c0_i32, %1, %c0_i32_0 : i32, i32, i32
  }
  func.func @transform_2(%arg0: i32, %arg1: i32) -> (i32, i32, i32) {
    %c1_i32 = arith.constant 1 : i32
    %0 = arith.muli %arg0, %c1_i32 : i32
    %1 = arith.addi %0, %arg1 : i32
    %c0_i32 = arith.constant 0 : i32
    %c0_i32_0 = arith.constant 0 : i32
    %c0_i32_1 = arith.constant 0 : i32
    return %c0_i32, %1, %c0_i32_0 : i32, i32, i32
  }
  func.func @transform_3(%arg0: i32, %arg1: i32) -> (i32, i32, i32) {
    %c0_i32 = arith.constant 0 : i32
    %c0_i32_0 = arith.constant 0 : i32
    %c0_i32_1 = arith.constant 0 : i32
    return %arg0, %c0_i32, %c0_i32_0 : i32, i32, i32
  }
}

</mosaic_0001>

<bundles_post_ra>
// kernel: tpu_custom_call.1
= control target key start
LH: loop header
LB: loop body
LE: loop exit
PB: predicated region body
PF: predicated region fallthrough
CT: control target
= control target key end

     0   :  { %8 = vsyncpa [#allocation4], 0  ;;  %s1111_s0 = inlined_call_operand.hbm [shape: f32[12,8,256], index: 0, kind: input, shape index: {}]   ;;  %s1112_s1 = inlined_call_operand.hbm [shape: f32[4,8,256], index: 1, kind: input, shape index: {}]   ;;  %s1113_s2 = inlined_call_operand.hbm [shape: f32[4,8,256], index: 2, kind: input, shape index: {}]   ;;  %s1114_s3 = inlined_call_operand.hbm [shape: f32[1,8,128], index: 3, kind: output, shape index: {}]  }
   0x1   :  { %9 = vsyncpa [#allocation7], 0 }
   0x2   :  { %10 = vsyncpa [#allocation5], 0  ;;  %s811_s12 = smov [#allocation6]   ;;  %s812_s14 = smov [#allocation3]  }
   0x3   :  { %s36_s13 = sshll.u32 %s811_s12, 4  ;;  %s20_s15 = sshll.u32 %s812_s14, 4  ;;  %s37_s13 = int_to_ptr.vmem [resolvable:$true] %s36_s13  ;;  %s838_s15 = int_to_ptr.vmem [resolvable:$true] %s20_s15 }
   0x4   :  { %s717_s18 = scalar_lea.hbm %s1112_s1, 1024 }
   0x5   :  { %p718_p0 = scmp.ne.s32.totalorder %s1112_s1, %s717_s18  ;;  %p721_p1 = scmp.lt.u32.totalorder %s717_s18, %s1112_s1 }
   0x7   :  { %p723_p2 = pnand %p721_p1, %p718_p0 }
   0x9   :  { %726 = shalt.err (!%p723_p2)
}
   0xa   :  { %s727_s23 = scalar_lea.vmem %s37_s13, 1024  ;;  %p732_p4 = scmp.lt.s32.totalorder %s37_s13, %s37_s13 }
   0xb   :  { %p728_p3 = scmp.ne.s32.totalorder %s37_s13, %s727_s23  ;;  %p733_p5 = scmp.lt.s32.totalorder %s727_s23, %s727_s23 }
   0xd   :  { %p734_p6 = por %p733_p5, %p732_p4 }
   0xf   :  { %p735_p7 = pnand %p734_p6, %p728_p3 }
  0x11   :  { %738 = shalt.err (!%p735_p7)
}
  0x12   :  { %s813_s24 = smov 256   ;;  %s814_s25 = smov 16  }
  0x13   :  { %42 = dma.hbm_to_vmem [thread:$0]  %s1112_s1, 1024, %s37_s13, [#allocation7], %s813_s24, %s813_s24, %s814_s25  }
  0x14   :  { %s739_s30 = scalar_lea.hbm %s1111_s0, 3072 }
  0x15   :  { %p740_p8 = scmp.ne.s32.totalorder %s1111_s0, %s739_s30  ;;  %p743_p9 = scmp.lt.u32.totalorder %s739_s30, %s1111_s0 }
  0x17   :  { %p745_p10 = pnand %p743_p9, %p740_p8 }
  0x19   :  { %748 = shalt.err (!%p745_p10)
}
  0x1a   :  { %s749_s8 = scalar_lea.vmem %s838_s15, 3072  ;;  %p754_p12 = scmp.lt.s32.totalorder %s838_s15, %s838_s15 }
  0x1b   :  { %p750_p11 = scmp.ne.s32.totalorder %s838_s15, %s749_s8  ;;  %p755_p13 = scmp.lt.s32.totalorder %s749_s8, %s749_s8 }
  0x1d   :  { %p756_p0 = por %p755_p13, %p754_p12 }
  0x1f   :  { %p757_p1 = pnand %p756_p0, %p750_p11 }
  0x21   :  { %760 = shalt.err (!%p757_p1)
}
  0x22   :  { %26 = dma.hbm_to_vmem [thread:$0]  %s1111_s0, 3072, %s838_s15, [#allocation4], %s813_s24, %s813_s24, %s814_s25  }
  0x23   :  { %s815_s10 = smov [#allocation8]   ;;  %s761_s14 = scalar_lea.hbm %s1113_s2, 1024 }
  0x24   :  { %s52_s11 = sshll.u32 %s815_s10, 4  ;;  %p762_p2 = scmp.ne.s32.totalorder %s1113_s2, %s761_s14  ;;  %s53_s11 = int_to_ptr.vmem [resolvable:$true] %s52_s11 }
  0x25   :  { %p765_p3 = scmp.lt.u32.totalorder %s761_s14, %s1113_s2 }
  0x27   :  { %p767_p4 = pnand %p765_p3, %p762_p2 }
  0x29   :  { %770 = shalt.err (!%p767_p4)
}
  0x2a   :  { %s771_s20 = scalar_lea.vmem %s53_s11, 1024  ;;  %p776_p6 = scmp.lt.s32.totalorder %s53_s11, %s53_s11 }
  0x2b   :  { %p772_p5 = scmp.ne.s32.totalorder %s53_s11, %s771_s20  ;;  %p777_p7 = scmp.lt.s32.totalorder %s771_s20, %s771_s20 }
  0x2d   :  { %p778_p8 = por %p777_p7, %p776_p6 }
  0x2f   :  { %p779_p9 = pnand %p778_p8, %p772_p5 }
  0x31   :  { %782 = shalt.err (!%p779_p9)
}
  0x32   :  { %58 = dma.hbm_to_vmem [thread:$0]  %s1113_s2, 1024, %s53_s11, [#allocation7], %s813_s24, %s813_s24, %s814_s25  }
  0x33   :  { %805 = dma.done.wait [#allocation4], 3072  }
  0x34   :  { %806 = vsyncadd [#allocation4], 4294964224 }
  0x35   :  { %807 = dma.done.wait [#allocation7], 2048  }
  0x36   :  { %808 = vsyncadd [#allocation7], 4294965248  ;;  %v890_v0 = vld [vmem:[#allocation8] sm:$0xff]  ;;  %v892_v1 = vld [vmem:[#allocation8 + $0x8] sm:$0xff]  ;;  %s817_s24 = smov [#allocation9]  }
  0x37   :  { %v101_v2 = vld [vmem:[#allocation8 + $0x10] sm:$0xff]  ;;  %v556_v3 = vadd.f32 %v892_v1, %v890_v0  ;;  %v102_v4 = vld [vmem:[#allocation8 + $0x18] sm:$0xff]  ;;  %v106_v5 = vld [vmem:[#allocation8 + $0x20] sm:$0xff]  ;;  %s629_s25 = sshll.u32 %s817_s24, 4  ;;  %s630_s25 = int_to_ptr.vmem [resolvable:$true] %s629_s25 }
  0x38   :  { %v107_v6 = vld [vmem:[#allocation8 + $0x28] sm:$0xff]  ;;  %v189_v7 = vsub.f32 %v101_v2, %v106_v5  ;;  %v214_v9 = vld [vmem:[#allocation3] sm:$0xff]  ;;  %v224_v11 = vld [vmem:[#allocation3 + $0x10] sm:$0xff]  ;;  %s783_s26 = scalar_lea.vmem %s630_s25, 128  ;;  %p788_p11 = scmp.lt.s32.totalorder %s630_s25, %s630_s25 }
  0x39   :  { %v190_v8 = vsub.f32 %v102_v4, %v107_v6  ;;  %v215_v10 = vld [vmem:[#allocation3 + $0x8] sm:$0xff]  ;;  %557 = vadd.xlane.f32.xlu0 %v556_v3  ;;  %v216_v12 = vand.u32 2147483647, %v214_v9  ;;  %v225_v14 = vld [vmem:[#allocation3 + $0x18] sm:$0xff]  ;;  %v234_v15 = vld [vmem:[#allocation3 + $0x20] sm:$0xff]  ;;  %p784_p10 = scmp.ne.s32.totalorder %s630_s25, %s783_s26  ;;  %p789_p12 = scmp.lt.s32.totalorder %s783_s26, %s783_s26 }
  0x3a   :  { %v217_v13 = vand.u32 2147483647, %v215_v10  ;;  %v191_v16 = vmul.f32 %v189_v7, %v189_v7  ;;  %v226_v18 = vand.u32 2147483647, %v224_v11  ;;  %v227_v19 = vand.u32 2147483647, %v225_v14 }
  0x3b   :  { %v192_v17 = vmul.f32 %v190_v8, %v190_v8  ;;  %v235_v20 = vld [vmem:[#allocation3 + $0x28] sm:$0xff]  ;;  %vm218_vm0 = vcmp.lt.f32.partialorder %v216_v12, inf  ;;  %v236_v21 = vand.u32 2147483647, %v234_v15  ;;  %v244_v27 = vld [vmem:[#allocation3 + $0x30] sm:$0xff]  ;;  %v245_v28 = vld [vmem:[#allocation3 + $0x38] sm:$0xff]  ;;  %p790_p13 = por %p789_p12, %p788_p11 }
  0x3c   :  { %vm219_vm1 = vcmp.lt.f32.partialorder %v217_v13, inf  ;;  %v237_v22 = vand.u32 2147483647, %v235_v20  ;;  %v199_v23 = vmul.f32 %v191_v16, %v890_v0  ;;  %v898_v25 = vsel %vm218_vm0, %v214_v9, 0.0  ;;  %v255_v29 = vld [vmem:[#allocation3 + $0x40] sm:$0xff]  ;;  %v256_v30 = vld [vmem:[#allocation3 + $0x48] sm:$0xff] }
  0x3d   :  { %v200_v24 = vmul.f32 %v192_v17, %v892_v1  ;;  %v900_v26 = vsel %vm219_vm1, %v215_v10, 0.0  ;;  %vm228_vm2 = vcmp.lt.f32.partialorder %v226_v18, inf  ;;  %vm229_vm3 = vcmp.lt.f32.partialorder %v227_v19, inf  ;;  %v266_v31 = vld [vmem:[#allocation3 + $0x50] sm:$0xff]  ;;  %v267_v36 = vld [vmem:[#allocation3 + $0x58] sm:$0xff]  ;;  %v277_v37 = vld [vmem:[#allocation3 + $0x60] sm:$0xff]  ;;  %p791_p0 = pnand %p790_p13, %p784_p10 }
  0x3e   :  { %vm238_vm4 = vcmp.lt.f32.partialorder %v236_v21, inf  ;;  %vm239_vm5 = vcmp.lt.f32.partialorder %v237_v22, inf  ;;  %v902_v33 = vsel %vm228_vm2, %v224_v11, 0.0  ;;  %v904_v34 = vsel %vm229_vm3, %v225_v14, 0.0  ;;  %v278_v41 = vld [vmem:[#allocation3 + $0x68] sm:$0xff]  ;;  %v288_v49 = vld [vmem:[#allocation3 + $0x70] sm:$0xff] }
  0x3f   :  { %v580_v32 = vadd.f32 %v200_v24, %v199_v23  ;;  %v906_v35 = vsel %vm238_vm4, %v234_v15, 0.0  ;;  %v908_v38 = vsel %vm239_vm5, %v235_v20, 0.0  ;;  %v246_v39 = vand.u32 2147483647, %v244_v27  ;;  %v289_v50 = vld [vmem:[#allocation3 + $0x78] sm:$0xff]  ;;  %v299_v53 = vld [vmem:[#allocation3 + $0x80] sm:$0xff] }
  0x40   :  { %v247_v40 = vand.u32 2147483647, %v245_v28  ;;  %v257_v42 = vand.u32 2147483647, %v255_v29  ;;  %v258_v43 = vand.u32 2147483647, %v256_v30 }
  0x41   :  { %581 = vadd.xlane.f32.xlu1 %v580_v32  ;;  %v268_v44 = vand.u32 2147483647, %v266_v31  ;;  %vm248_vm6 = vcmp.lt.f32.partialorder %v246_v39, inf  ;;  %v269_v45 = vand.u32 2147483647, %v267_v36  ;;  %v300_v54 = vld [vmem:[#allocation3 + $0x88] sm:$0xff] }
  0x42   :  { %vm249_vm7 = vcmp.lt.f32.partialorder %v247_v40, inf  ;;  %v279_v46 = vand.u32 2147483647, %v277_v37  ;;  %v910_v47 = vsel %vm248_vm6, %v244_v27, 0.0  ;;  %vm259_vm8 = vcmp.lt.f32.partialorder %v257_v42, inf  ;;  %v310_v58 = vld [vmem:[#allocation3 + $0x90] sm:$0xff] }
  0x43   :  { %v912_v48 = vsel %vm249_vm7, %v245_v28, 0.0  ;;  %vm260_vm9 = vcmp.lt.f32.partialorder %v258_v43, inf  ;;  %v914_v51 = vsel %vm259_vm8, %v255_v29, 0.0  ;;  %vm270_vm10 = vcmp.lt.f32.partialorder %v268_v44, inf  ;;  %v311_v62 = vld [vmem:[#allocation3 + $0x98] sm:$0xff]  ;;  %v321_v4 = vld [vmem:[#allocation3 + $0xa0] sm:$0xff] }
  0x44   :  { %v916_v52 = vsel %vm260_vm9, %v256_v30, 0.0  ;;  %vm271_vm11 = vcmp.lt.f32.partialorder %v269_v45, inf  ;;  %v918_v55 = vsel %vm270_vm10, %v266_v31, 0.0  ;;  %v280_v57 = vand.u32 2147483647, %v278_v41  ;;  %v322_v8 = vld [vmem:[#allocation3 + $0xa8] sm:$0xff] }
  0x45   :  { %v920_v56 = vsel %vm271_vm11, %v267_v36, 0.0  ;;  %vm281_vm12 = vcmp.lt.f32.partialorder %v279_v46, inf  ;;  %v290_v60 = vand.u32 2147483647, %v288_v49  ;;  %v291_v61 = vand.u32 2147483647, %v289_v50 }
  0x46   :  { %v922_v59 = vsel %vm281_vm12, %v277_v37, 0.0  ;;  %v340_v63 = vsub.f32 %v898_v25, %v910_v47  ;;  %vm282_vm13 = vcmp.lt.f32.partialorder %v280_v57, inf  ;;  %v301_v2 = vand.u32 2147483647, %v299_v53  ;;  %v332_v11 = vld [vmem:[#allocation3 + $0xb0] sm:$0xff]  ;;  %v333_v12 = vld [vmem:[#allocation3 + $0xb8] sm:$0xff] }
  0x47   :  { %v302_v3 = vand.u32 2147483647, %v300_v54  ;;  %v341_v5 = vsub.f32 %v900_v26, %v912_v48  ;;  %v928_v6 = vsel %vm282_vm13, %v278_v41, 0.0  ;;  %vm292_vm14 = vcmp.lt.f32.partialorder %v290_v60, inf }
  0x48   :  { %vm293_vm15 = vcmp.lt.f32.partialorder %v291_v61, inf  ;;  %v312_v7 = vand.u32 2147483647, %v310_v58  ;;  %v930_v9 = vsel %vm292_vm14, %v288_v49, 0.0  ;;  %vm303_vm0 = vcmp.lt.f32.partialorder %v301_v2, inf }
  0x49   :  { %v932_v10 = vsel %vm293_vm15, %v289_v50, 0.0  ;;  %vm304_vm1 = vcmp.lt.f32.partialorder %v302_v3, inf  ;;  %v934_v13 = vsel %vm303_vm0, %v299_v53, 0.0  ;;  %v313_v15 = vand.u32 2147483647, %v311_v62 }
  0x4a   :  { %v936_v14 = vsel %vm304_vm1, %v300_v54, 0.0  ;;  %vm314_vm2 = vcmp.lt.f32.partialorder %v312_v7, inf  ;;  %v323_v17 = vand.u32 2147483647, %v321_v4  ;;  %v324_v18 = vand.u32 2147483647, %v322_v8 }
  0x4b   :  { %v938_v16 = vsel %vm314_vm2, %v310_v58, 0.0  ;;  %v342_v19 = vmul.f32 %v340_v63, %v340_v63  ;;  %vm315_vm3 = vcmp.lt.f32.partialorder %v313_v15, inf  ;;  %v334_v20 = vand.u32 2147483647, %v332_v11 }
  0x4c   :  { %v335_v21 = vand.u32 2147483647, %v333_v12  ;;  %v343_v22 = vmul.f32 %v341_v5, %v341_v5  ;;  %v940_v23 = vsel %vm315_vm3, %v311_v62, 0.0  ;;  %vm325_vm4 = vcmp.lt.f32.partialorder %v323_v17, inf }
  0x4d   :  { %vm326_vm5 = vcmp.lt.f32.partialorder %v324_v18, inf  ;;  %v346_v24 = vsub.f32 %v902_v33, %v914_v51  ;;  %v944_v27 = vsel %vm325_vm4, %v321_v4, 0.0  ;;  %vm336_vm6 = vcmp.lt.f32.partialorder %v334_v20, inf }
  0x4e   :  { %v946_v28 = vsel %vm326_vm5, %v322_v8, 0.0  ;;  %vm337_vm7 = vcmp.lt.f32.partialorder %v335_v21, inf  ;;  %v948_v29 = vsel %vm336_vm6, %v332_v11, 0.0  ;;  %v347_v31 = vsub.f32 %v904_v34, %v916_v52 }
  0x4f   :  { %v950_v30 = vsel %vm337_vm7, %v333_v12, 0.0  ;;  %v348_v32 = vmul.f32 %v346_v24, %v346_v24  ;;  %v352_v36 = vsub.f32 %v906_v35, %v918_v55  ;;  %v353_v37 = vsub.f32 %v908_v38, %v920_v56 }
  0x50   :  { %v370_v39 = vsub.f32 %v898_v25, %v922_v59  ;;  %v371_v40 = vsub.f32 %v900_v26, %v928_v6  ;;  %v349_v41 = vmul.f32 %v347_v31, %v347_v31  ;;  %v376_v43 = vsub.f32 %v902_v33, %v930_v9 }
  0x51   :  { %v350_v42 = vadd.f32 %v348_v32, %v342_v19  ;;  %v377_v44 = vsub.f32 %v904_v34, %v932_v10  ;;  %v354_v45 = vmul.f32 %v352_v36, %v352_v36  ;;  %v355_v46 = vmul.f32 %v353_v37, %v353_v37 }
  0x52   :  { %v372_v49 = vmul.f32 %v370_v39, %v370_v39  ;;  %v373_v50 = vmul.f32 %v371_v40, %v371_v40  ;;  %v351_v53 = vadd.f32 %v349_v41, %v343_v22  ;;  %v378_v54 = vmul.f32 %v376_v43, %v376_v43 }
  0x53   :  { %v379_v57 = vmul.f32 %v377_v44, %v377_v44  ;;  %v382_v58 = vsub.f32 %v906_v35, %v934_v13  ;;  %v356_v60 = vadd.f32 %v354_v45, %v350_v42  ;;  %v383_v61 = vsub.f32 %v908_v38, %v936_v14 }
  0x54   :  { %v400_v62 = vsub.f32 %v898_v25, %v938_v16  ;;  %v401_v63 = vsub.f32 %v900_v26, %v940_v23  ;;  %v357_v2 = vadd.f32 %v355_v46, %v351_v53  ;;  %v380_v3 = vadd.f32 %v378_v54, %v372_v49 }
  0x55   :  { %v381_v4 = vadd.f32 %v379_v57, %v373_v50  ;;  %v384_v5 = vmul.f32 %v382_v58, %v382_v58  ;;  %v358_v7 = vmax.f32 %v356_v60, 1e-06  ;;  %v385_v8 = vmul.f32 %v383_v61, %v383_v61 }
  0x56   :  { %v402_v11 = vmul.f32 %v400_v62, %v400_v62  ;;  %v403_v12 = vmul.f32 %v401_v63, %v401_v63  ;;  %v359_v15 = vmax.f32 %v357_v2, 1e-06  ;;  %v406_v18 = vsub.f32 %v902_v33, %v944_v27 }
  0x57   :  { %v386_v17 = vadd.f32 %v384_v5, %v380_v3  ;;  %v407_v19 = vsub.f32 %v904_v34, %v946_v28  ;;  %v360_v25 = vmin.f32 %v358_v7, 50.0  ;;  %v387_v20 = vadd.f32 %v385_v8, %v381_v4 }
  0x58   :  { %v412_v26 = vsub.f32 %v906_v35, %v948_v29  ;;  %v413_v21 = vsub.f32 %v908_v38, %v950_v30  ;;  %v361_v22 = vmin.f32 %v359_v15, 50.0  ;;  %v408_v31 = vmul.f32 %v406_v18, %v406_v18 }
  0x59   :  { %v388_v24 = vmax.f32 %v386_v17, 1e-06  ;;  %v409_v32 = vmul.f32 %v407_v19, %v407_v19  ;;  %v362_v36 = vsub.f32 0.0, %v360_v25  ;;  %v389_v37 = vmax.f32 %v387_v20, 1e-06 }
  0x5a   :  { %v414_v39 = vmul.f32 %v412_v26, %v412_v26  ;;  %v415_v40 = vmul.f32 %v413_v21, %v413_v21  ;;  %v363_v33 = vsub.f32 0.0, %v361_v22  ;;  %v410_v42 = vadd.f32 %v408_v31, %v402_v11 }
  0x5b   :  { %v390_v41 = vmin.f32 %v388_v24, 50.0  ;;  %v411_v34 = vadd.f32 %v409_v32, %v403_v12  ;;  %v364_v43 = vmul.f32 1.442695, %v362_v36  ;;  %v391_v44 = vmin.f32 %v389_v37, 50.0 }
  0x5c   :  { %v430_v35 = vsub.f32 %v910_v47, %v922_v59  ;;  %v431_v38 = vsub.f32 %v912_v48, %v928_v6  ;;  %v366_v45 = vmul.f32 1.442695, %v363_v33  ;;  %v416_v49 = vadd.f32 %v414_v39, %v410_v42 }
  0x5d   :  { %v392_v46 = vsub.f32 0.0, %v390_v41  ;;  %v417_v50 = vadd.f32 %v415_v40, %v411_v34  ;;  %673 = vpow2.f32 %v364_v43  ;;  %v393_v53 = vsub.f32 0.0, %v391_v44 }
  0x5e   :  { %v432_v54 = vmul.f32 %v430_v35, %v430_v35  ;;  %v418_v58 = vmax.f32 %v416_v49, 1e-06  ;;  %v433_v61 = vmul.f32 %v431_v38, %v431_v38  ;;  %675 = vpow2.f32 %v366_v45 }
  0x5f   :  { %v394_v57 = vmul.f32 1.442695, %v392_v46  ;;  %v419_v60 = vmax.f32 %v417_v50, 1e-06  ;;  %v436_v62 = vsub.f32 %v914_v51, %v930_v9  ;;  %v437_v63 = vsub.f32 %v916_v52, %v932_v10 }
  0x60   :  { %v442_v2 = vsub.f32 %v918_v55, %v934_v13  ;;  %v396_v3 = vmul.f32 1.442695, %v393_v53  ;;  %v420_v4 = vmin.f32 %v418_v58, 50.0  ;;  %v443_v7 = vsub.f32 %v920_v56, %v936_v14 }
  0x61   :  { %v421_v5 = vmin.f32 %v419_v60, 50.0  ;;  %677 = vpow2.f32 %v394_v57  ;;  %v438_v8 = vmul.f32 %v436_v62, %v436_v62  ;;  %v439_v11 = vmul.f32 %v437_v63, %v437_v63 }
  0x62   :  { %v444_v12 = vmul.f32 %v442_v2, %v442_v2  ;;  %v422_v15 = vsub.f32 0.0, %v420_v4  ;;  %v445_v18 = vmul.f32 %v443_v7, %v443_v7  ;;  %v460_v19 = vsub.f32 %v910_v47, %v938_v16  ;;  %v1016_v2 = vld [vmem:[#allocation6] sm:$0xff] }
  0x63   :  { %v423_v17 = vsub.f32 0.0, %v421_v5  ;;  %v440_v25 = vadd.f32 %v438_v8, %v432_v54  ;;  %v441_v20 = vadd.f32 %v439_v11, %v433_v61  ;;  %v461_v26 = vsub.f32 %v912_v48, %v940_v23  ;;  %v1024_v8 = vld [vmem:[#allocation6 + $0x8] sm:$0xff]  ;;  %v1026_v11 = vld [vmem:[#allocation6 + $0x18] sm:$0xff] }
  0x64   :  { %v466_v21 = vsub.f32 %v914_v51, %v944_v27  ;;  %v85_v22 = vlaneseq  ;;  %679 = vpow2.f32 %v396_v3  ;;  %v462_v24 = vmul.f32 %v460_v19, %v460_v19 }
  0x65   :  { %v467_v31 = vsub.f32 %v916_v52, %v946_v28  ;;  %v446_v32 = vadd.f32 %v444_v12, %v440_v25  ;;  %v447_v36 = vadd.f32 %v445_v18, %v441_v20  ;;  %v463_v37 = vmul.f32 %v461_v26, %v461_v26  ;;  %v1028_v12 = vld [vmem:[#allocation6 + $0x20] sm:$0xff]  ;;  %v1035_v20 = vld [vmem:[#allocation6 + $0x28] sm:$0xff] }
  0x66   :  { %v468_v39 = vmul.f32 %v466_v21, %v466_v21  ;;  %v424_v40 = vmul.f32 1.442695, %v422_v15  ;;  %v472_v33 = vsub.f32 %v918_v55, %v948_v29  ;;  %v473_v48 = vsub.f32 %v920_v56, %v950_v30 }
  0x67   :  { %v469_v47 = vmul.f32 %v467_v31, %v467_v31  ;;  %v1006_v41 = vpop.eup %673  ;;  %v426_v51 = vmul.f32 1.442695, %v423_v17  ;;  %v448_v42 = vmax.f32 %v446_v32, 1e-06  ;;  %v449_v34 = vmax.f32 %v447_v36, 1e-06 }
  0x68   :  { %v470_v43 = vadd.f32 %v468_v39, %v462_v24  ;;  %v474_v52 = vmul.f32 %v472_v33, %v472_v33  ;;  %v475_v35 = vmul.f32 %v473_v48, %v473_v48  ;;  %v490_v38 = vsub.f32 %v922_v59, %v938_v16  ;;  %v676_v45 = vpop.eup %675  ;;  %v1042_v36 = vld [vmem:[#allocation6 + $0x38] sm:$0xff] }
  0x69   :  { %v471_v44 = vadd.f32 %v469_v47, %v463_v37  ;;  %v450_v46 = vmin.f32 %v448_v42, 50.0  ;;  %v451_v49 = vmin.f32 %v449_v34, 50.0  ;;  %v491_v55 = vsub.f32 %v928_v6, %v940_v23  ;;  %v1018_v6 = vld [vmem:[#allocation6 + $0x10] sm:$0xff] }
  0x6a   :  { %v496_v56 = vsub.f32 %v930_v9, %v944_v27  ;;  %v476_v50 = vadd.f32 %v474_v52, %v470_v43  ;;  %v492_v54 = vmul.f32 %v490_v38, %v490_v38  ;;  %v497_v57 = vsub.f32 %v932_v10, %v946_v28 }
  0x6b   :  { %v477_v53 = vadd.f32 %v475_v35, %v471_v44  ;;  %v678_v58 = vpop.eup %677  ;;  %681 = vpow2.f32 %v424_v40  ;;  %v452_v60 = vsub.f32 0.0, %v450_v46  ;;  %v453_v61 = vsub.f32 0.0, %v451_v49 }
  0x6c   :  { %v493_v59 = vmul.f32 %v491_v55, %v491_v55  ;;  %683 = vpow2.f32 %v426_v51  ;;  %v478_v16 = vmax.f32 %v476_v50, 1e-06  ;;  %v498_v63 = vmul.f32 %v496_v56, %v496_v56 }
  0x6d   :  { %v479_v62 = vmax.f32 %v477_v53, 1e-06  ;;  %v454_v9 = vmul.f32 1.442695, %v452_v60  ;;  %v456_v23 = vmul.f32 1.442695, %v453_v61  ;;  %v499_v27 = vmul.f32 %v497_v57, %v497_v57 }
  0x6e   :  { %v502_v3 = vsub.f32 %v934_v13, %v948_v29  ;;  %v680_v10 = vpop.eup %679  ;;  %v480_v28 = vmin.f32 %v478_v16, 50.0  ;;  %v500_v5 = vadd.f32 %v498_v63, %v492_v54  ;;  %v503_v7 = vsub.f32 %v936_v14, %v950_v30  ;;  %v1037_v14 = vld [vmem:[#allocation6 + $0x30] sm:$0xff] }
  0x6f   :  { %v481_v4 = vmin.f32 %v479_v62, 50.0  ;;  %v501_v15 = vadd.f32 %v499_v27, %v493_v59  ;;  %v129_v18 = vmax.f32 %v1016_v2, %v1018_v6  ;;  %v1033_v13 = vand.u32 127, %v85_v22 }
  0x70   :  { %v504_v17 = vmul.f32 %v502_v3, %v502_v3  ;;  %v482_v29 = vsub.f32 0.0, %v480_v28  ;;  %v505_v25 = vmul.f32 %v503_v7, %v503_v7  ;;  %685 = vpow2.f32 %v454_v9 }
  0x71   :  { %v483_v19 = vsub.f32 0.0, %v481_v4  ;;  %v130_v26 = vmax.f32 %v1024_v8, %v1026_v11  ;;  %v131_v21 = vmax.f32 %v129_v18, %v1028_v12  ;;  %687 = vpow2.f32 %v456_v23 }
  0x72   :  { %v506_v30 = vadd.f32 %v504_v17, %v500_v5  ;;  %v484_v24 = vmul.f32 1.442695, %v482_v29  ;;  %v507_v32 = vadd.f32 %v505_v25, %v501_v15  ;;  %v1045_v37 = vshrl.u32 %v85_v22, 7 }
  0x73   :  { %v486_v31 = vmul.f32 1.442695, %v483_v19  ;;  %v132_v40 = vmax.f32 %v130_v26, %v1035_v20  ;;  %v1049_v47 = vmax.f32 %v131_v21, %v1037_v14  ;;  %v89_v33 = vadd.s32 128, %v1033_v13 }
  0x74   :  { %v508_v39 = vmax.f32 %v506_v30, 1e-06  ;;  %v398_v48 = vadd.f32 %v678_v58, %v1006_v41  ;;  %v399_v51 = vadd.f32 %v680_v10, %v676_v45  ;;  %v509_v42 = vmax.f32 %v507_v32, 1e-06 }
  0x75   :  { %v682_v34 = vpop.eup %681  ;;  %689 = vpow2.f32 %v484_v24  ;;  %v1054_v44 = vmax.f32 %v132_v40, %v1042_v36  ;;  %v135_v22 = vsub.f32 %v1016_v2, %v1049_v47  ;;  %v141_v38 = vsub.f32 %v1018_v6, %v1049_v47  ;;  %v111_v40 = vld [vmem:[#allocation8 + $0x30] sm:$0xff] }
  0x76   :  { %v510_v43 = vmin.f32 %v508_v39, 50.0  ;;  %v684_v52 = vpop.eup %683  ;;  %691 = vpow2.f32 %v486_v31  ;;  %v511_v35 = vmin.f32 %v509_v42, 50.0  ;;  %v149_v41 = vsub.f32 %v1028_v12, %v1049_v47  ;;  %v112_v42 = vld [vmem:[#allocation8 + $0x38] sm:$0xff] }
  0x77   :  { %v136_v46 = vsub.f32 %v1024_v8, %v1054_v44  ;;  %v137_v49 = vmul.f32 1.442695, %v135_v22  ;;  %v142_v55 = vsub.f32 %v1026_v11, %v1054_v44  ;;  %v90_v56 = vmul.u32 256, %v1045_v37 }
  0x78   :  { %v512_v45 = vsub.f32 0.0, %v510_v43  ;;  %v513_v50 = vsub.f32 0.0, %v511_v35  ;;  %v143_v53 = vmul.f32 1.442695, %v141_v38  ;;  %v150_v54 = vsub.f32 %v1035_v20, %v1054_v44 }
  0x79   :  { %693 = vpow2.f32 %v137_v49  ;;  %v139_v58 = vmul.f32 1.442695, %v136_v46  ;;  %v157_v60 = vsub.f32 %v1037_v14, %v1049_v47  ;;  %v428_v61 = vadd.f32 %v682_v34, %v398_v48 }
  0x7a   :  { %v514_v57 = vmul.f32 1.442695, %v512_v45  ;;  %v516_v59 = vmul.f32 1.442695, %v513_v50  ;;  %695 = vpow2.f32 %v143_v53  ;;  %v145_v16 = vmul.f32 1.442695, %v142_v55  ;;  %v686_v62 = vpop.eup %685 }
  0x7b   :  { %v429_v63 = vadd.f32 %v684_v52, %v399_v51  ;;  %v151_v9 = vmul.f32 1.442695, %v149_v41  ;;  %v158_v23 = vsub.f32 %v1042_v36, %v1054_v44  ;;  %v688_v27 = vpop.eup %687  ;;  %v153_v3 = vmul.f32 1.442695, %v150_v54 }
  0x7c   :  { %697 = vpow2.f32 %v514_v57  ;;  %v159_v10 = vmul.f32 1.442695, %v157_v60  ;;  %v91_v28 = vadd.s32 %v90_v56, %v1033_v13  ;;  %v458_v4 = vadd.f32 %v686_v62, %v428_v61 }
  0x7d   :  { %699 = vpow2.f32 %v516_v59  ;;  %v161_v5 = vmul.f32 1.442695, %v158_v23  ;;  %v92_v15 = vadd.s32 %v90_v56, %v89_v33  ;;  %v459_v17 = vadd.f32 %v688_v27, %v429_v63 }
  0x7e   :  { %701 = vpow2.f32 %v139_v58  ;;  %vm206_vm8 = vcmp.lt.s32.totalorder %v91_v28, 16  ;;  %v816_v21 = vmov 0.0   ;;  %v171_v38 = vmax.f32 %v111_v40, 0.0 }
  0x7f   :  { %703 = vpow2.f32 %v145_v16  ;;  %v690_v7 = vpop.eup %689  ;;  %vm207_vm9 = vcmp.lt.s32.totalorder %v92_v15, 16  ;;  %v656_v24 = vsel %vm206_vm8, 1.0, %v816_v21  ;;  %v172_v46 = vmax.f32 %v112_v42, 0.0 }
  0x80   :  { %705 = vpow2.f32 %v151_v9  ;;  %v692_v18 = vpop.eup %691  ;;  %v488_v29 = vadd.f32 %v690_v7, %v458_v4  ;;  %v657_v32 = vsel %vm207_vm9, 1.0, %v816_v21  ;;  %v173_v57 = vmin.f32 %v171_v38, 3.0 }
  0x81   :  { %707 = vpow2.f32 %v153_v3  ;;  %v489_v25 = vadd.f32 %v692_v18, %v459_v17  ;;  %v174_v58 = vmin.f32 %v172_v46, 3.0  ;;  %vm602_vm0 = vcmp.eq.s32.totalorder %v1045_v37, 0 }
  0x82   :  { %709 = vpow2.f32 %v159_v10  ;;  %vm175_vm10 = vcmp.eq.f32.partialorder %v173_v57, 2.0  ;;  %vm179_vm12 = vcmp.eq.f32.partialorder %v173_v57, 1.0  ;;  %vm183_vm14 = vcmp.eq.f32.partialorder %v173_v57, 0.0 }
  0x83   :  { %711 = vpow2.f32 %v161_v5  ;;  %v694_v19 = vpop.eup %693  ;;  %vm176_vm11 = vcmp.eq.f32.partialorder %v174_v58, 2.0  ;;  %v177_v60 = vsel %vm175_vm10, %v1028_v12, %v1037_v14  ;;  %vm180_vm13 = vcmp.eq.f32.partialorder %v174_v58, 1.0 }
  0x84   :  { %v696_v30 = vpop.eup %695  ;;  %v178_v61 = vsel %vm176_vm11, %v1035_v20, %v1042_v36  ;;  %v181_v59 = vsel %vm179_vm12, %v1018_v6, %v177_v60  ;;  %vm184_vm15 = vcmp.eq.f32.partialorder %v174_v58, 0.0  ;;  %vm603_vm1 = vcmp.eq.s32.totalorder %v1033_v13, 0 }
  0x85   :  { %v147_v33 = vadd.f32 %v696_v30, %v694_v19  ;;  %v182_v62 = vsel %vm180_vm13, %v1026_v11, %v178_v61  ;;  %v185_v27 = vsel %vm183_vm14, %v1016_v2, %v181_v59  ;;  %vm607_vm2 = vcmp.eq.s32.totalorder %v1033_v13, 1  ;;  %vm604_vm3 = vmand %vm602_vm0, %vm603_vm1 }
  0x86   :  { %v698_v26 = vpop.eup %697  ;;  %v186_v12 = vsel %vm184_vm15, %v1024_v8, %v182_v62  ;;  %vm612_vm4 = vcmp.eq.s32.totalorder %v1033_v13, 2  ;;  %vm608_vm5 = vmand %vm602_vm0, %vm607_vm2  ;;  %vm617_vm6 = vcmp.eq.s32.totalorder %v1033_v13, 3 }
  0x87   :  { %v700_v31 = vpop.eup %699  ;;  %v518_v39 = vadd.f32 %v698_v26, %v488_v29  ;;  %vm613_vm7 = vmand %vm602_vm0, %vm612_vm4 }
  0x88   :  { %v702_v48 = vpop.eup %701  ;;  %v519_v51 = vadd.f32 %v700_v31, %v489_v25  ;;  %vm618_vm8 = vmand %vm602_vm0, %vm617_vm6 }
  0x89   :  { %v704_v34 = vpop.eup %703  ;;  %v520_v43 = vmul.f32 %v656_v24, %v518_v39 }
  0x8a   :  { %v706_v22 = vpop.eup %705  ;;  %v521_v52 = vmul.f32 %v657_v32, %v519_v51  ;;  %v148_v35 = vadd.f32 %v704_v34, %v702_v48 }
  0x8b   :  { %v708_v41 = vpop.eup %707  ;;  %v155_v45 = vadd.f32 %v706_v22, %v147_v33 }
  0x8c   :  { %v710_v49 = vpop.eup %709  ;;  %v592_v55 = vadd.f32 %v521_v52, %v520_v43  ;;  %v156_v56 = vadd.f32 %v708_v41, %v148_v35 }
  0x8d   :  { %v712_v50 = vpop.eup %711  ;;  %v163_v53 = vadd.f32 %v710_v49, %v155_v45 }
  0x8e   :  { %593 = vadd.xlane.f32.xlu1 %v592_v55  ;;  %v164_v54 = vadd.f32 %v712_v50, %v156_v56 }
  0x8f   :  { %713 = vlog2.f32 %v163_v53 }
  0x90   :  { %715 = vlog2.f32 %v164_v54 }
  0x99   :  { %v714_v16 = vpop.eup %713 }
  0x9a   :  { %v716_v63 = vpop.eup %715  ;;  %v166_v9 = vmul.f32 0.6931472, %v714_v16 }
  0x9b   :  { %v168_v23 = vmul.f32 0.6931472, %v716_v63 }
  0x9c   :  { %v169_v3 = vadd.f32 %v166_v9, %v1049_v47 }
  0x9d   :  { %v170_v14 = vadd.f32 %v168_v23, %v1054_v44 }
  0x9e   :  { %v187_v20 = vsub.f32 %v169_v3, %v185_v27 }
  0x9f   :  { %v188_v36 = vsub.f32 %v170_v14, %v186_v12 }
  0xa0   :  { %v195_v6 = vmul.f32 %v187_v20, %v890_v0 }
  0xa1   :  { %v196_v10 = vmul.f32 %v188_v36, %v892_v1 }
  0xa3   :  { %v568_v28 = vadd.f32 %v196_v10, %v195_v6 }
  0xa5   :  { %569 = vadd.xlane.f32.xlu0 %v568_v28 }
  0xc6   :  { %v558_v11 = vpop.xlane.xlu0 %557 }
  0xc7   :  { %v559_v4 = vrot.slane %v558_v11, 4 }
  0xc9   :  { %v560_v5 = vadd.f32 %v559_v4, %v558_v11 }
  0xcb   :  { %v561_v7 = vrot.slane %v560_v5, 2 }
  0xcd   :  { %v562_v15 = vadd.f32 %v561_v7, %v560_v5 }
  0xce   :  { %v582_v47 = vpop.xlane.xlu1 %581 }
  0xcf   :  { %v563_v2 = vrot.slane %v562_v15, 1  ;;  %v583_v18 = vrot.slane %v582_v47, 4 }
  0xd1   :  { %v564_v17 = vadd.f32 %v563_v2, %v562_v15  ;;  %v584_v29 = vadd.f32 %v583_v18, %v582_v47 }
  0xd3   :  { %658 = vpush %v564_v17  ;;  %v585_v25 = vrot.slane %v584_v29, 2 }
  0xd5   :  { %v586_v21 = vadd.f32 %v585_v25, %v584_v29 }
  0xd7   :  { %v587_v39 = vrot.slane %v586_v21, 1 }
  0xd9   :  { %v588_v51 = vadd.f32 %v587_v39, %v586_v21 }
 0x104   :  { %s659_s2 = spop %658 }
 0x105   :  { %v605_v34 = vstv %s659_s2 }
 0x106   :  { %v606_v22 = vsel %vm604_vm3, %v605_v34, 0.0 }
 0x11b   :  { %v594_v8 = vpop.xlane.xlu1 %593 }
 0x11c   :  { %v595_v44 = vrot.slane %v594_v8, 4 }
 0x11e   :  { %v596_v19 = vadd.f32 %v595_v44, %v594_v8 }
 0x120   :  { %v597_v30 = vrot.slane %v596_v19, 2 }
 0x122   :  { %v598_v24 = vadd.f32 %v597_v30, %v596_v19 }
 0x124   :  { %v599_v33 = vrot.slane %v598_v24, 1 }
 0x126   :  { %v600_v42 = vadd.f32 %v599_v33, %v598_v24 }
 0x132   :  { %v570_v0 = vpop.xlane.xlu0 %569 }
 0x133   :  { %v571_v1 = vrot.slane %v570_v0, 4 }
 0x135   :  { %v572_v26 = vadd.f32 %v571_v1, %v570_v0 }
 0x137   :  { %v573_v31 = vrot.slane %v572_v26, 2 }
 0x139   :  { %v574_v32 = vadd.f32 %v573_v31, %v572_v26 }
 0x13b   :  { %v575_v40 = vrot.slane %v574_v32, 1 }
 0x13d   :  { %v576_v48 = vadd.f32 %v575_v40, %v574_v32 }
 0x13f   :  { %660 = vpush %v576_v48 }
 0x140   :  { %662 = vpush %v588_v51 }
 0x141   :  { %664 = vpush %v600_v42 }
 0x170   :  { %s661_s21 = spop %660 }
 0x171   :  { %v609_v43 = vstv %s661_s21  ;;  %s663_s22 = spop %662 }
 0x172   :  { %v610_v52 = vsel %vm608_vm5, %v609_v43, 0.0  ;;  %v614_v35 = vstv %s663_s22  ;;  %s665_s23 = spop %664 }
 0x173   :  { %v611_v38 = vadd.f32 %v610_v52, %v606_v22  ;;  %v619_v41 = vstv %s665_s23  ;;  %v615_v45 = vsel %vm613_vm7, %v614_v35, 0.0 }
 0x174   :  { %v620_v49 = vsel %vm618_vm8, %v619_v41, 0.0 }
 0x175   :  { %v616_v46 = vadd.f32 %v615_v45, %v611_v38 }
 0x177   :  { %v621_v13 = vadd.f32 %v620_v49, %v616_v46 }
 0x179   :  { %622 = vst [vmem:[#allocation9] sm:$0xff] %v621_v13 }
 0x17a   :  { %794 = shalt.err (!%p791_p0)
}
 0x17b   :  { %s795_s29 = scalar_lea.hbm %s1114_s3, 128 }
 0x17c   :  { %p796_p1 = scmp.ne.s32.totalorder %s1114_s3, %s795_s29  ;;  %p799_p2 = scmp.lt.u32.totalorder %s795_s29, %s1114_s3 }
 0x17e   :  { %p801_p3 = pnand %p799_p2, %p796_p1 }
 0x180   :  { %804 = shalt.err (!%p801_p3)
}
 0x181   :  { %632 = dma.vmem_to_hbm [thread:$0]  %s630_s25, 128, %s1114_s3, [#allocation5]  }
 0x182   :  { %809 = dma.done.wait [#allocation5], 128  }
 0x183   :  { %810 = vsyncadd [#allocation5], 4294967168 }
 0x184   :  { %636 = vsyncpa [#allocation4], 1 }
 0x185   :  { %637 = vsyncpa [#allocation7], 1 }
 0x186   :  { %638 = vsyncpa [#allocation5], 1 }

</bundles_post_ra>
